<compile_context>
chip_gen: v5e
topology: v5e:2x2
jax: 0.10.0
libtpu: 0.0.40
codegen_flags: <defaults>
</compile_context>

<pallas_src>
import functools

import jax
import jax.numpy as jnp
from jax import lax
from jax.experimental import pallas as pl
from jax.experimental.pallas import tpu as pltpu

EPS = 1e-5

# Scoped-VMEM request. Worst case at the default tile caps (tile_m<=1024, tile_k<=2048,
# Ctot<=1024) is ~15-25 MiB (double-buffered bf16 x/w blocks + resident f32 accumulator
# + double-buffered bf16 y blocks + stats), so 48 MiB leaves headroom and still fits
# v7x's 64 MiB physical VMEM (v5e/v6e have 128 MiB physical; scoped defaults are
# 16 MiB on v5e and 32 MiB on v6e/v7x).
VMEM_LIMIT = 48 * 1024 * 1024

_HI = lax.Precision.HIGHEST     # reference only


def _round_up(a, b):
    return (a + b - 1) // b * b


def _cparams(sems):
    return pltpu.CompilerParams(dimension_semantics=sems,
                                vmem_limit_bytes=VMEM_LIMIT)


def _pick_tile_m(m, cap=1024):
    # Large tiles amortize grid-step overhead & weight re-fetch, but always produce
    # >= 2 M tiles when M allows so both v7x TensorCores are fed (M axis is "parallel").
    t = min(cap, _round_up((m + 1) // 2, 8))
    return max(8, t)


def _pick_tile_k(c, cap=2048):
    # Exact K tiling: tile_k divides 27*C (no padded K -> no dead MXU passes / DMA bytes).
    k_full = 27 * c
    if k_full <= cap:
        return k_full, k_full                     # single exact K step
    if c % 128 == 0:
        for taps in (9, 3, 1):
            tk = taps * c                         # multiple of 128, divides 27*C
            if tk <= cap:
                return tk, k_full
    # Fallback (C not a multiple of 128 and 27*C too large): pad K to 128-multiples.
    tk = max(128, (min(cap, _round_up(k_full, 128)) // 128) * 128)
    return tk, _round_up(k_full, tk)


# ----------------------------- Pallas kernels --------------------------------

def conv_gemm_kernel(x_ref, w_ref, y_ref, ssum_ref, ssq_ref, acc_ref):
    # Pass 1: tiled GEMM, bf16 operands, f32 accumulation in a VMEM scratch.
    # At k==last: write y in bf16 (halves writeback) and emit exact per-M-tile BN
    # partial sums / sum-of-squares computed from the f32 accumulator.
    k = pl.program_id(1)

    @pl.when(k == 0)
    def _init():
        acc_ref[...] = jnp.zeros_like(acc_ref)

    acc_ref[...] += jnp.dot(x_ref[...], w_ref[...],
                            preferred_element_type=jnp.float32)

    @pl.when(k == pl.num_programs(1) - 1)
    def _finalize():
        acc = acc_ref[...]
        y_ref[...] = acc.astype(y_ref.dtype)
        ssum_ref[...] = jnp.sum(acc, axis=0, keepdims=True)[None]        # (1,1,Ctot)
        ssq_ref[...] = jnp.sum(acc * acc, axis=0, keepdims=True)[None]   # (1,1,Ctot)


def bn_relu_kernel(y_ref, a_ref, c_ref, o_ref):
    # Pass 2: relu(y*a + c), a = gamma*rsqrt(var+eps), c = beta - gamma*mean*rsqrt.
    y = y_ref[...].astype(jnp.float32)
    o_ref[...] = jnp.maximum(y * a_ref[...] + c_ref[...], 0.0).astype(o_ref.dtype)


def bn_relu_add_kernel(y_ref, a_ref, c_ref, r_ref, o_ref):
    # Pass 2 of the second conv: BN + ReLU plus the carried residual columns
    # (residual was computed inside conv1's GEMM via the folded center-tap weight).
    y = y_ref[...].astype(jnp.float32)
    act = jnp.maximum(y * a_ref[...] + c_ref[...], 0.0)
    o_ref[...] = (act + r_ref[...].astype(jnp.float32)).astype(o_ref.dtype)


# ------------------------------- glue / wrappers ------------------------------

def maxpool3d(x, k, s):
    # PyTorch MaxPool3d (no padding) as a fused XLA maximum tree over the k^3 strided
    # views: no window-stack materialization, no Pallas call (per perf review — a Pallas
    # kernel here would only add an inflated copy or a C/128-lane-utilization reduce).
    N, D, H, W, C = x.shape
    Do, Ho, Wo = (D - k) // s + 1, (H - k) // s + 1, (W - k) // s + 1
    out = None
    for kd in range(k):
        for kh in range(k):
            for kw in range(k):
                v = x[:, kd:kd + s * Do:s, kh:kh + s * Ho:s, kw:kw + s * Wo:s, :]
                out = v if out is None else jnp.maximum(out, v)
    return out


def _im2col_3x3x3(x):
    # x: (N, D, H, W, C) -> (N*D*H*W, 27*C), same-padded 3x3x3 patches,
    # ordered (kd, kh, kw, c) to match the folded PyTorch weight layout.
    # TODO(synk): replace with in-kernel halo'd tile reads (manual DMA) — see header.
    N, D, H, W, C = x.shape
    xp = jnp.pad(x, ((0, 0), (1, 1), (1, 1), (1, 1), (0, 0)))
    cols = []
    for kd in range(3):
        for kh in range(3):
            for kw in range(3):
                cols.append(xp[:, kd:kd + D, kh:kh + H, kw:kw + W, :])
    return jnp.concatenate(cols, axis=-1).reshape(N * D * H * W, 27 * C)


def _fold_w(w_oidhw):
    # torch conv weight (O, I, kd, kh, kw) -> GEMM weight (27*I, O)
    return jnp.transpose(w_oidhw, (2, 3, 4, 1, 0)).reshape(-1, w_oidhw.shape[0])


def _pad2(a, rows, cols):
    return jnp.pad(a, ((0, rows - a.shape[0]), (0, cols - a.shape[1])))


def _conv_gemm(x_col, w_fold, tile_m, tile_k):
    # x_col: (M_pad, K_pad) bf16, w_fold: (K_pad, Ctot) bf16 -> y (M_pad, Ctot) bf16
    # plus exact f32 per-M-tile BN partial stats.
    M_pad, K_pad = x_col.shape
    Ctot = w_fold.shape[1]
    num_m, num_k = M_pad // tile_m, K_pad // tile_k
    return pl.pallas_call(
        conv_gemm_kernel,
        grid=(num_m, num_k),
        in_specs=[pl.BlockSpec((tile_m, tile_k), lambda m, k: (m, k)),
                  pl.BlockSpec((tile_k, Ctot), lambda m, k: (k, 0))],
        out_specs=(pl.BlockSpec((tile_m, Ctot), lambda m, k: (m, 0)),
                   pl.BlockSpec((1, 1, Ctot), lambda m, k: (m, 0, 0)),
                   pl.BlockSpec((1, 1, Ctot), lambda m, k: (m, 0, 0))),
        out_shape=(jax.ShapeDtypeStruct((M_pad, Ctot), jnp.bfloat16),
                   jax.ShapeDtypeStruct((num_m, 1, Ctot), jnp.float32),
                   jax.ShapeDtypeStruct((num_m, 1, Ctot), jnp.float32)),
        scratch_shapes=[pltpu.VMEM((tile_m, Ctot), jnp.float32)],
        compiler_params=_cparams(("parallel", "arbitrary")),
        cost_estimate=pl.CostEstimate(
            flops=2 * M_pad * K_pad * Ctot,
            transcendentals=0,
            bytes_accessed=2 * (M_pad * K_pad + K_pad * Ctot + M_pad * Ctot)),
    )(x_col, w_fold)


def _bn_affine(ssum, ssq, gamma, beta, m_real, cpad):
    # Reduce the per-tile partials into global training-mode BN stats, then fold into an
    # affine (a, c) so pass 2 is a single FMA + ReLU per element. Only the first `cpad`
    # columns are used (residual columns carried in conv1's output are not BN'd).
    s = jnp.sum(ssum[:, 0, :cpad], axis=0)
    q = jnp.sum(ssq[:, 0, :cpad], axis=0)
    mean = s / m_real
    var = jnp.maximum(q / m_real - mean * mean, 0.0)
    inv = lax.rsqrt(var + EPS)
    g = jnp.pad(gamma, (0, cpad - gamma.shape[0]))
    b = jnp.pad(beta, (0, cpad - beta.shape[0]))
    a = (g * inv)[None, :].astype(jnp.float32)
    c = (b - g * mean * inv)[None, :].astype(jnp.float32)
    return a, c


def _bn_relu(y, a, c, tile_m, cpad, out_dtype):
    # y may be wider than cpad (conv1 output carries the residual columns on the right);
    # the BlockSpec reads only the left `cpad` columns (no XLA slice copy).
    M_pad = y.shape[0]
    return pl.pallas_call(
        bn_relu_kernel,
        grid=(M_pad // tile_m,),
        in_specs=[pl.BlockSpec((tile_m, cpad), lambda m: (m, 0)),
                  pl.BlockSpec((1, cpad), lambda m: (0, 0)),
                  pl.BlockSpec((1, cpad), lambda m: (0, 0))],
        out_specs=pl.BlockSpec((tile_m, cpad), lambda m: (m, 0)),
        out_shape=jax.ShapeDtypeStruct((M_pad, cpad), out_dtype),
        compiler_params=_cparams(("parallel",)),
    )(y, a, c)


def _bn_relu_add(y, a, c, ycat1, tile_m, cpad, out_dtype):
    # Final pass: relu(bn(y2)) + residual, residual read directly from the RIGHT half of
    # conv1's GEMM output via a column-offset index_map (block index 1 on the lane axis).
    M_pad = y.shape[0]
    return pl.pallas_call(
        bn_relu_add_kernel,
        grid=(M_pad // tile_m,),
        in_specs=[pl.BlockSpec((tile_m, cpad), lambda m: (m, 0)),
                  pl.BlockSpec((1, cpad), lambda m: (0, 0)),
                  pl.BlockSpec((1, cpad), lambda m: (0, 0)),
                  pl.BlockSpec((tile_m, cpad), lambda m: (m, 1))],
        out_specs=pl.BlockSpec((tile_m, cpad), lambda m: (m, 0)),
        out_shape=jax.ShapeDtypeStruct((M_pad, cpad), out_dtype),
        compiler_params=_cparams(("parallel",)),
    )(y, a, c, ycat1)


def conv3d_block(p, params, tile_m_cap=1024, tile_k_cap=2048):
    # Conv3d module: conv1->BN->ReLU -> conv2->BN->ReLU, plus 1x1x1 residual(p).
    N, D, H, W, Cin = p.shape
    Cout = params["w1"].shape[0]
    M = N * D * H * W
    Cpad = _round_up(Cout, 128)          # lane-dense output channels
    Ctot1 = 2 * Cpad                     # conv1 GEMM emits [conv1 | residual]:
                                         # fills the 256-wide MXU N on v6e/v7x for free
                                         # (on v5e it costs extra passes but deletes the
                                         # separate residual path entirely).

    tile_m = _pick_tile_m(M, tile_m_cap)
    M_pad = _round_up(M, tile_m)         # zero-row padding: contributes 0 to BN sums

    # ---- conv1 (+ folded 1x1x1 residual): GEMM -> BN + ReLU, bf16 activations ----
    tk1, K1_pad = _pick_tile_k(Cin, tile_k_cap)
    x1 = _pad2(_im2col_3x3x3(p.astype(jnp.bfloat16)), M_pad, K1_pad)
    w1 = _fold_w(params["w1"])                                   # (27*Cin, Cout)
    wres = params["wres"][:, :, 0, 0, 0].T                       # (Cin, Cout)
    w1cat = jnp.zeros((K1_pad, Ctot1), jnp.float32)
    w1cat = w1cat.at[:27 * Cin, :Cout].set(w1)
    # residual = center tap (kd=kh=kw=1 -> tap index 13) of the same im2col matrix.
    w1cat = w1cat.at[13 * Cin:14 * Cin, Cpad:Cpad + Cout].set(wres)
    y1, s1, q1 = _conv_gemm(x1, w1cat.astype(jnp.bfloat16), tile_m, tk1)
    a1, c1 = _bn_affine(s1, q1, params["g1"], params["beta1"], M, Cpad)
    h1 = _bn_relu(y1, a1, c1, tile_m, Cpad, jnp.bfloat16)        # left half of y1 only

    # ---- conv2: GEMM -> BN + ReLU + carried residual, f32 output ----
    tk2, K2_pad = _pick_tile_k(Cout, tile_k_cap)
    h1v = h1[:M, :Cout].reshape(N, D, H, W, Cout)
    x2 = _pad2(_im2col_3x3x3(h1v), M_pad, K2_pad)
    w2 = _pad2(_fold_w(params["w2"]).astype(jnp.bfloat16), K2_pad, Cpad)
    y2, s2, q2 = _conv_gemm(x2, w2, tile_m, tk2)
    a2, c2 = _bn_affine(s2, q2, params["g2"], params["beta2"], M, Cpad)

    out = _bn_relu_add(y2, a2, c2, y1, tile_m, Cpad, jnp.float32)
    return out[:M, :Cout].reshape(N, D, H, W, Cout)


def down_forward(x_ncdhw, params, pool_k, pool_s):
    x = jnp.transpose(x_ncdhw, (0, 2, 3, 4, 1))        # NCDHW -> NDHWC
    p = maxpool3d(x, pool_k, pool_s)
    y = conv3d_block(p, params)
    return jnp.transpose(y, (0, 4, 1, 2, 3))           # NDHWC -> NCDHW


# --------------------------- params & reference -------------------------------

def init_params(key, cin, cout):
    ks = jax.random.split(key, 5)
    return dict(
        w1=0.1 * jax.random.normal(ks[0], (cout, cin, 3, 3, 3), jnp.float32),
        b1=0.1 * jax.random.normal(ks[1], (cout,), jnp.float32),
        g1=jnp.ones((cout,), jnp.float32),
        beta1=jnp.zeros((cout,), jnp.float32),
        w2=0.1 * jax.random.normal(ks[2], (cout, cout, 3, 3, 3), jnp.float32),
        b2=0.1 * jax.random.normal(ks[3], (cout,), jnp.float32),
        g2=jnp.ones((cout,), jnp.float32),
        beta2=jnp.zeros((cout,), jnp.float32),
        wres=0.1 * jax.random.normal(ks[4], (cout, cin, 1, 1, 1), jnp.float32),
    )


def reference_forward(x_ncdhw, params, k, s):
    # Pure-JAX f32/HIGHEST reference of the PyTorch forward (training-mode BN,
    # conv biases included: they are cancelled exactly by the BN mean).
    x = jnp.transpose(x_ncdhw, (0, 2, 3, 4, 1))
    p = lax.reduce_window(x, -jnp.inf, lax.max,
                          (1, k, k, k, 1), (1, s, s, s, 1), "VALID")

    def conv3(h, w_t, b):
        w = jnp.transpose(w_t, (2, 3, 4, 1, 0))        # DHWIO
        y = lax.conv_general_dilated(
            h, w, (1, 1, 1), "SAME",
            dimension_numbers=("NDHWC", "DHWIO", "NDHWC"), precision=_HI)
        return y + b

    def bn_relu(y, g, beta):
        mean = jnp.mean(y, axis=(0, 1, 2, 3), keepdims=True)
        var = jnp.mean((y - mean) ** 2, axis=(0, 1, 2, 3), keepdims=True)
        return jnp.maximum((y - mean) * lax.rsqrt(var + EPS) * g + beta, 0.0)

    h1 = bn_relu(conv3(p, params["w1"], params["b1"]), params["g1"], params["beta1"])
    h2 = bn_relu(conv3(h1, params["w2"], params["b2"]), params["g2"], params["beta2"])
    res = jnp.einsum("ndhwc,co->ndhwo", p, params["wres"][:, :, 0, 0, 0].T,
                     precision=_HI)
    return jnp.transpose(h2 + res, (0, 4, 1, 2, 3))


# ------------------------------------ main ------------------------------------

if __name__ == "__main__":
    key = jax.random.PRNGKey(0)
    kx, kp = jax.random.split(key)

    N, Cin, Cout, D = 2, 4, 8, 8
    pool_k = pool_s = 2

    x = jax.random.normal(kx, (N, Cin, D, D, D), jnp.float32)   # NCDHW, like PyTorch
    params = init_params(kp, Cin, Cout)

    fwd = jax.jit(functools.partial(down_forward, pool_k=pool_k, pool_s=pool_s))
    out = jax.block_until_ready(fwd(x, params))

    assert out.shape == (N, Cout, D // pool_s, D // pool_s, D // pool_s)
    ref = reference_forward(x, params, pool_k, pool_s)
    # bf16 MXU operands / bf16 intermediates (f32 accumulation + exact f32 BN stats)
    # vs f32/HIGHEST reference.
    err = float(jnp.max(jnp.abs(out - ref)))
    assert jnp.allclose(out, ref, rtol=5e-2, atol=5e-2), err

    print("KERNEL_OK")
</pallas_src>

<mosaic_0001>
module attributes {stable_mosaic.version = 11 : i64} {
  func.func @conv_gemm_kernel(%arg0: i32, %arg1: i32, %arg2: memref<64x108xbf16, #tpu.memory_space<vmem>>, %arg3: memref<108x256xbf16, #tpu.memory_space<vmem>>, %arg4: memref<64x256xbf16, #tpu.memory_space<vmem>>, %arg5: memref<1x1x256xf32, #tpu.memory_space<vmem>>, %arg6: memref<1x1x256xf32, #tpu.memory_space<vmem>>, %arg7: memref<64x256xf32, #tpu.memory_space<vmem>>) attributes {dimension_semantics = [#tpu.dimension_semantics<parallel>, #tpu.dimension_semantics<arbitrary>], iteration_bounds = array<i64: 2, 1>, scalar_prefetch = 0 : i64, scratch_operands = 1 : i64, tpu.core_type = #tpu.core_type<tc>, window_params = [{transform_indices = @transform_0, window_bounds = array<i64: 64, 108>}, {transform_indices = @transform_1, window_bounds = array<i64: 108, 256>}, {transform_indices = @transform_2, window_bounds = array<i64: 64, 256>}, {transform_indices = @transform_3, window_bounds = array<i64: 1, 1, 256>}, {transform_indices = @transform_4, window_bounds = array<i64: 1, 1, 256>}]} {
    %c0_i32 = arith.constant 0 : i32
    %0 = arith.cmpi eq, %arg1, %c0_i32 : i32
    %1 = arith.extui %0 : i1 to i32
    %c0_i32_0 = arith.constant 0 : i32
    %2 = arith.cmpi ne, %1, %c0_i32_0 : i32
    scf.if %2 {
      %cst_10 = arith.constant 0.000000e+00 : f32
      %12 = vector.broadcast %cst_10 : f32 to vector<64x256xf32>
      %c0_11 = arith.constant 0 : index
      %c0_12 = arith.constant 0 : index
      %13 = vector.load %arg7[%c0_11, %c0_12] : memref<64x256xf32, #tpu.memory_space<vmem>>, vector<64x256xf32>
      tpu.vector_store %arg7[%c0_11, %c0_12], %12 {strides = array<i32>} : memref<64x256xf32, #tpu.memory_space<vmem>>, vector<64x256xf32>,
    } else {
    }
    %c0 = arith.constant 0 : index
    %c0_1 = arith.constant 0 : index
    %3 = vector.load %arg7[%c0, %c0_1] : memref<64x256xf32, #tpu.memory_space<vmem>>, vector<64x256xf32>
    %c0_2 = arith.constant 0 : index
    %c0_3 = arith.constant 0 : index
    %4 = vector.load %arg2[%c0_2, %c0_3] : memref<64x108xbf16, #tpu.memory_space<vmem>>, vector<64x108xbf16>
    %c0_4 = arith.constant 0 : index
    %c0_5 = arith.constant 0 : index
    %5 = vector.load %arg3[%c0_4, %c0_5] : memref<108x256xbf16, #tpu.memory_space<vmem>>, vector<108x256xbf16>
    %cst = arith.constant dense<0.000000e+00> : vector<64x256xf32>
    %6 = tpu.matmul %4, %5, %cst {dimension_numbers = #tpu.dot_dimension_numbers<[1], [0], [0], [1], [0, 0, 1, 1], [], []>} : vector<64x108xbf16>, vector<108x256xbf16>, vector<64x256xf32> -> vector<64x256xf32>
    %7 = arith.addf %3, %6 : vector<64x256xf32>
    %c0_6 = arith.constant 0 : index
    %c0_7 = arith.constant 0 : index
    %8 = vector.load %arg7[%c0_6, %c0_7] : memref<64x256xf32, #tpu.memory_space<vmem>>, vector<64x256xf32>
    tpu.vector_store %arg7[%c0_6, %c0_7], %7 {strides = array<i32>} : memref<64x256xf32, #tpu.memory_space<vmem>>, vector<64x256xf32>,
    %c0_i32_8 = arith.constant 0 : i32
    %9 = arith.cmpi eq, %arg1, %c0_i32_8 : i32
    %10 = arith.extui %9 : i1 to i32
    %c0_i32_9 = arith.constant 0 : i32
    %11 = arith.cmpi ne, %10, %c0_i32_9 : i32
    scf.if %11 {
      %c0_10 = arith.constant 0 : index
      %c0_11 = arith.constant 0 : index
      %12 = vector.load %arg7[%c0_10, %c0_11] : memref<64x256xf32, #tpu.memory_space<vmem>>, vector<64x256xf32>
      %13 = arith.truncf %12 : vector<64x256xf32> to vector<64x256xbf16>
      %c0_12 = arith.constant 0 : index
      %c0_13 = arith.constant 0 : index
      %14 = vector.load %arg4[%c0_12, %c0_13] : memref<64x256xbf16, #tpu.memory_space<vmem>>, vector<64x256xbf16>
      tpu.vector_store %arg4[%c0_12, %c0_13], %13 {strides = array<i32>} : memref<64x256xbf16, #tpu.memory_space<vmem>>, vector<64x256xbf16>,
      %cst_14 = arith.constant dense<0.000000e+00> : vector<256xf32>
      %15 = vector.multi_reduction <add>, %12, %cst_14 [0] : vector<64x256xf32> to vector<256xf32>
      %16 = vector.shape_cast %15 : vector<256xf32> to vector<1x256xf32>
      %17 = vector.shape_cast %16 : vector<1x256xf32> to vector<1x1x256xf32>
      %c0_15 = arith.constant 0 : index
      %c0_16 = arith.constant 0 : index
      %c0_17 = arith.constant 0 : index
      %18 = vector.load %arg5[%c0_15, %c0_16, %c0_17] : memref<1x1x256xf32, #tpu.memory_space<vmem>>, vector<1x1x256xf32>
      tpu.vector_store %arg5[%c0_15, %c0_16, %c0_17], %17 {strides = array<i32>} : memref<1x1x256xf32, #tpu.memory_space<vmem>>, vector<1x1x256xf32>,
      %19 = arith.mulf %12, %12 : vector<64x256xf32>
      %cst_18 = arith.constant dense<0.000000e+00> : vector<256xf32>
      %20 = vector.multi_reduction <add>, %19, %cst_18 [0] : vector<64x256xf32> to vector<256xf32>
      %21 = vector.shape_cast %20 : vector<256xf32> to vector<1x256xf32>
      %22 = vector.shape_cast %21 : vector<1x256xf32> to vector<1x1x256xf32>
      %c0_19 = arith.constant 0 : index
      %c0_20 = arith.constant 0 : index
      %c0_21 = arith.constant 0 : index
      %23 = vector.load %arg6[%c0_19, %c0_20, %c0_21] : memref<1x1x256xf32, #tpu.memory_space<vmem>>, vector<1x1x256xf32>
      tpu.vector_store %arg6[%c0_19, %c0_20, %c0_21], %22 {strides = array<i32>} : memref<1x1x256xf32, #tpu.memory_space<vmem>>, vector<1x1x256xf32>,
    } else {
    }
    return
  }
  func.func @transform_0(%arg0: i32, %arg1: i32) -> (i32, i32) {
    %c0_i32 = arith.constant 0 : i32
    return %arg0, %arg1 : i32, i32
  }
  func.func @transform_1(%arg0: i32, %arg1: i32) -> (i32, i32) {
    %c0_i32 = arith.constant 0 : i32
    %c0_i32_0 = arith.constant 0 : i32
    return %arg1, %c0_i32 : i32, i32
  }
  func.func @transform_2(%arg0: i32, %arg1: i32) -> (i32, i32) {
    %c0_i32 = arith.constant 0 : i32
    %c0_i32_0 = arith.constant 0 : i32
    return %arg0, %c0_i32 : i32, i32
  }
  func.func @transform_3(%arg0: i32, %arg1: i32) -> (i32, i32, i32) {
    %c0_i32 = arith.constant 0 : i32
    %c0_i32_0 = arith.constant 0 : i32
    %c0_i32_1 = arith.constant 0 : i32
    return %arg0, %c0_i32, %c0_i32_0 : i32, i32, i32
  }
  func.func @transform_4(%arg0: i32, %arg1: i32) -> (i32, i32, i32) {
    %c0_i32 = arith.constant 0 : i32
    %c0_i32_0 = arith.constant 0 : i32
    %c0_i32_1 = arith.constant 0 : i32
    return %arg0, %c0_i32, %c0_i32_0 : i32, i32, i32
  }
}

module attributes {stable_mosaic.version = 11 : i64} {
  func.func @bn_relu_kernel(%arg0: i32, %arg1: memref<64x128xbf16, #tpu.memory_space<vmem>>, %arg2: memref<1x128xf32, #tpu.memory_space<vmem>>, %arg3: memref<1x128xf32, #tpu.memory_space<vmem>>, %arg4: memref<64x128xbf16, #tpu.memory_space<vmem>>) attributes {dimension_semantics = [#tpu.dimension_semantics<parallel>], iteration_bounds = array<i64: 2>, scalar_prefetch = 0 : i64, scratch_operands = 0 : i64, tpu.core_type = #tpu.core_type<tc>, window_params = [{transform_indices = @transform_0, window_bounds = array<i64: 64, 128>}, {pipeline_mode = #tpu.pipeline_mode<synchronous>, transform_indices = @transform_1, window_bounds = array<i64: 1, 128>}, {pipeline_mode = #tpu.pipeline_mode<synchronous>, transform_indices = @transform_2, window_bounds = array<i64: 1, 128>}, {transform_indices = @transform_3, window_bounds = array<i64: 64, 128>}]} {
    %c0 = arith.constant 0 : index
    %c0_0 = arith.constant 0 : index
    %0 = vector.load %arg1[%c0, %c0_0] : memref<64x128xbf16, #tpu.memory_space<vmem>>, vector<64x128xbf16>
    %1 = arith.extf %0 : vector<64x128xbf16> to vector<64x128xf32>
    %c0_1 = arith.constant 0 : index
    %c0_2 = arith.constant 0 : index
    %2 = vector.load %arg2[%c0_1, %c0_2] : memref<1x128xf32, #tpu.memory_space<vmem>>, vector<1x128xf32>
    %3 = vector.broadcast %2 : vector<1x128xf32> to vector<64x128xf32>
    %4 = arith.mulf %1, %3 : vector<64x128xf32>
    %c0_3 = arith.constant 0 : index
    %c0_4 = arith.constant 0 : index
    %5 = vector.load %arg3[%c0_3, %c0_4] : memref<1x128xf32, #tpu.memory_space<vmem>>, vector<1x128xf32>
    %6 = vector.broadcast %5 : vector<1x128xf32> to vector<64x128xf32>
    %7 = arith.addf %4, %6 : vector<64x128xf32>
    %cst = arith.constant 0.000000e+00 : f32
    %8 = vector.broadcast %cst : f32 to vector<64x128xf32>
    %9 = arith.maximumf %7, %8 : vector<64x128xf32>
    %10 = arith.truncf %9 : vector<64x128xf32> to vector<64x128xbf16>
    %c0_5 = arith.constant 0 : index
    %c0_6 = arith.constant 0 : index
    %11 = vector.load %arg4[%c0_5, %c0_6] : memref<64x128xbf16, #tpu.memory_space<vmem>>, vector<64x128xbf16>
    tpu.vector_store %arg4[%c0_5, %c0_6], %10 {strides = array<i32>} : memref<64x128xbf16, #tpu.memory_space<vmem>>, vector<64x128xbf16>,
    return
  }
  func.func @transform_0(%arg0: i32) -> (i32, i32) {
    %c0_i32 = arith.constant 0 : i32
    %c0_i32_0 = arith.constant 0 : i32
    return %arg0, %c0_i32 : i32, i32
  }
  func.func @transform_1(%arg0: i32) -> (i32, i32) {
    %c0_i32 = arith.constant 0 : i32
    %c0_i32_0 = arith.constant 0 : i32
    %c0_i32_1 = arith.constant 0 : i32
    return %c0_i32, %c0_i32_0 : i32, i32
  }
  func.func @transform_2(%arg0: i32) -> (i32, i32) {
    %c0_i32 = arith.constant 0 : i32
    %c0_i32_0 = arith.constant 0 : i32
    %c0_i32_1 = arith.constant 0 : i32
    return %c0_i32, %c0_i32_0 : i32, i32
  }
  func.func @transform_3(%arg0: i32) -> (i32, i32) {
    %c0_i32 = arith.constant 0 : i32
    %c0_i32_0 = arith.constant 0 : i32
    return %arg0, %c0_i32 : i32, i32
  }
}

module attributes {stable_mosaic.version = 11 : i64} {
  func.func @conv_gemm_kernel(%arg0: i32, %arg1: i32, %arg2: memref<64x216xbf16, #tpu.memory_space<vmem>>, %arg3: memref<216x128xbf16, #tpu.memory_space<vmem>>, %arg4: memref<64x128xbf16, #tpu.memory_space<vmem>>, %arg5: memref<1x1x128xf32, #tpu.memory_space<vmem>>, %arg6: memref<1x1x128xf32, #tpu.memory_space<vmem>>, %arg7: memref<64x128xf32, #tpu.memory_space<vmem>>) attributes {dimension_semantics = [#tpu.dimension_semantics<parallel>, #tpu.dimension_semantics<arbitrary>], iteration_bounds = array<i64: 2, 1>, scalar_prefetch = 0 : i64, scratch_operands = 1 : i64, tpu.core_type = #tpu.core_type<tc>, window_params = [{transform_indices = @transform_0, window_bounds = array<i64: 64, 216>}, {transform_indices = @transform_1, window_bounds = array<i64: 216, 128>}, {transform_indices = @transform_2, window_bounds = array<i64: 64, 128>}, {transform_indices = @transform_3, window_bounds = array<i64: 1, 1, 128>}, {transform_indices = @transform_4, window_bounds = array<i64: 1, 1, 128>}]} {
    %c0_i32 = arith.constant 0 : i32
    %0 = arith.cmpi eq, %arg1, %c0_i32 : i32
    %1 = arith.extui %0 : i1 to i32
    %c0_i32_0 = arith.constant 0 : i32
    %2 = arith.cmpi ne, %1, %c0_i32_0 : i32
    scf.if %2 {
      %cst_10 = arith.constant 0.000000e+00 : f32
      %12 = vector.broadcast %cst_10 : f32 to vector<64x128xf32>
      %c0_11 = arith.constant 0 : index
      %c0_12 = arith.constant 0 : index
      %13 = vector.load %arg7[%c0_11, %c0_12] : memref<64x128xf32, #tpu.memory_space<vmem>>, vector<64x128xf32>
      tpu.vector_store %arg7[%c0_11, %c0_12], %12 {strides = array<i32>} : memref<64x128xf32, #tpu.memory_space<vmem>>, vector<64x128xf32>,
    } else {
    }
    %c0 = arith.constant 0 : index
    %c0_1 = arith.constant 0 : index
    %3 = vector.load %arg7[%c0, %c0_1] : memref<64x128xf32, #tpu.memory_space<vmem>>, vector<64x128xf32>
    %c0_2 = arith.constant 0 : index
    %c0_3 = arith.constant 0 : index
    %4 = vector.load %arg2[%c0_2, %c0_3] : memref<64x216xbf16, #tpu.memory_space<vmem>>, vector<64x216xbf16>
    %c0_4 = arith.constant 0 : index
    %c0_5 = arith.constant 0 : index
    %5 = vector.load %arg3[%c0_4, %c0_5] : memref<216x128xbf16, #tpu.memory_space<vmem>>, vector<216x128xbf16>
    %cst = arith.constant dense<0.000000e+00> : vector<64x128xf32>
    %6 = tpu.matmul %4, %5, %cst {dimension_numbers = #tpu.dot_dimension_numbers<[1], [0], [0], [1], [0, 0, 1, 1], [], []>} : vector<64x216xbf16>, vector<216x128xbf16>, vector<64x128xf32> -> vector<64x128xf32>
    %7 = arith.addf %3, %6 : vector<64x128xf32>
    %c0_6 = arith.constant 0 : index
    %c0_7 = arith.constant 0 : index
    %8 = vector.load %arg7[%c0_6, %c0_7] : memref<64x128xf32, #tpu.memory_space<vmem>>, vector<64x128xf32>
    tpu.vector_store %arg7[%c0_6, %c0_7], %7 {strides = array<i32>} : memref<64x128xf32, #tpu.memory_space<vmem>>, vector<64x128xf32>,
    %c0_i32_8 = arith.constant 0 : i32
    %9 = arith.cmpi eq, %arg1, %c0_i32_8 : i32
    %10 = arith.extui %9 : i1 to i32
    %c0_i32_9 = arith.constant 0 : i32
    %11 = arith.cmpi ne, %10, %c0_i32_9 : i32
    scf.if %11 {
      %c0_10 = arith.constant 0 : index
      %c0_11 = arith.constant 0 : index
      %12 = vector.load %arg7[%c0_10, %c0_11] : memref<64x128xf32, #tpu.memory_space<vmem>>, vector<64x128xf32>
      %13 = arith.truncf %12 : vector<64x128xf32> to vector<64x128xbf16>
      %c0_12 = arith.constant 0 : index
      %c0_13 = arith.constant 0 : index
      %14 = vector.load %arg4[%c0_12, %c0_13] : memref<64x128xbf16, #tpu.memory_space<vmem>>, vector<64x128xbf16>
      tpu.vector_store %arg4[%c0_12, %c0_13], %13 {strides = array<i32>} : memref<64x128xbf16, #tpu.memory_space<vmem>>, vector<64x128xbf16>,
      %cst_14 = arith.constant dense<0.000000e+00> : vector<128xf32>
      %15 = vector.multi_reduction <add>, %12, %cst_14 [0] : vector<64x128xf32> to vector<128xf32>
      %16 = vector.shape_cast %15 : vector<128xf32> to vector<1x128xf32>
      %17 = vector.shape_cast %16 : vector<1x128xf32> to vector<1x1x128xf32>
      %c0_15 = arith.constant 0 : index
      %c0_16 = arith.constant 0 : index
      %c0_17 = arith.constant 0 : index
      %18 = vector.load %arg5[%c0_15, %c0_16, %c0_17] : memref<1x1x128xf32, #tpu.memory_space<vmem>>, vector<1x1x128xf32>
      tpu.vector_store %arg5[%c0_15, %c0_16, %c0_17], %17 {strides = array<i32>} : memref<1x1x128xf32, #tpu.memory_space<vmem>>, vector<1x1x128xf32>,
      %19 = arith.mulf %12, %12 : vector<64x128xf32>
      %cst_18 = arith.constant dense<0.000000e+00> : vector<128xf32>
      %20 = vector.multi_reduction <add>, %19, %cst_18 [0] : vector<64x128xf32> to vector<128xf32>
      %21 = vector.shape_cast %20 : vector<128xf32> to vector<1x128xf32>
      %22 = vector.shape_cast %21 : vector<1x128xf32> to vector<1x1x128xf32>
      %c0_19 = arith.constant 0 : index
      %c0_20 = arith.constant 0 : index
      %c0_21 = arith.constant 0 : index
      %23 = vector.load %arg6[%c0_19, %c0_20, %c0_21] : memref<1x1x128xf32, #tpu.memory_space<vmem>>, vector<1x1x128xf32>
      tpu.vector_store %arg6[%c0_19, %c0_20, %c0_21], %22 {strides = array<i32>} : memref<1x1x128xf32, #tpu.memory_space<vmem>>, vector<1x1x128xf32>,
    } else {
    }
    return
  }
  func.func @transform_0(%arg0: i32, %arg1: i32) -> (i32, i32) {
    %c0_i32 = arith.constant 0 : i32
    return %arg0, %arg1 : i32, i32
  }
  func.func @transform_1(%arg0: i32, %arg1: i32) -> (i32, i32) {
    %c0_i32 = arith.constant 0 : i32
    %c0_i32_0 = arith.constant 0 : i32
    return %arg1, %c0_i32 : i32, i32
  }
  func.func @transform_2(%arg0: i32, %arg1: i32) -> (i32, i32) {
    %c0_i32 = arith.constant 0 : i32
    %c0_i32_0 = arith.constant 0 : i32
    return %arg0, %c0_i32 : i32, i32
  }
  func.func @transform_3(%arg0: i32, %arg1: i32) -> (i32, i32, i32) {
    %c0_i32 = arith.constant 0 : i32
    %c0_i32_0 = arith.constant 0 : i32
    %c0_i32_1 = arith.constant 0 : i32
    return %arg0, %c0_i32, %c0_i32_0 : i32, i32, i32
  }
  func.func @transform_4(%arg0: i32, %arg1: i32) -> (i32, i32, i32) {
    %c0_i32 = arith.constant 0 : i32
    %c0_i32_0 = arith.constant 0 : i32
    %c0_i32_1 = arith.constant 0 : i32
    return %arg0, %c0_i32, %c0_i32_0 : i32, i32, i32
  }
}

module attributes {stable_mosaic.version = 11 : i64} {
  func.func @bn_relu_add_kernel(%arg0: i32, %arg1: memref<64x128xbf16, #tpu.memory_space<vmem>>, %arg2: memref<1x128xf32, #tpu.memory_space<vmem>>, %arg3: memref<1x128xf32, #tpu.memory_space<vmem>>, %arg4: memref<64x128xbf16, #tpu.memory_space<vmem>>, %arg5: memref<64x128xf32, #tpu.memory_space<vmem>>) attributes {dimension_semantics = [#tpu.dimension_semantics<parallel>], iteration_bounds = array<i64: 2>, scalar_prefetch = 0 : i64, scratch_operands = 0 : i64, tpu.core_type = #tpu.core_type<tc>, window_params = [{transform_indices = @transform_0, window_bounds = array<i64: 64, 128>}, {pipeline_mode = #tpu.pipeline_mode<synchronous>, transform_indices = @transform_1, window_bounds = array<i64: 1, 128>}, {pipeline_mode = #tpu.pipeline_mode<synchronous>, transform_indices = @transform_2, window_bounds = array<i64: 1, 128>}, {transform_indices = @transform_3, window_bounds = array<i64: 64, 128>}, {transform_indices = @transform_4, window_bounds = array<i64: 64, 128>}]} {
    %c0 = arith.constant 0 : index
    %c0_0 = arith.constant 0 : index
    %0 = vector.load %arg1[%c0, %c0_0] : memref<64x128xbf16, #tpu.memory_space<vmem>>, vector<64x128xbf16>
    %1 = arith.extf %0 : vector<64x128xbf16> to vector<64x128xf32>
    %c0_1 = arith.constant 0 : index
    %c0_2 = arith.constant 0 : index
    %2 = vector.load %arg2[%c0_1, %c0_2] : memref<1x128xf32, #tpu.memory_space<vmem>>, vector<1x128xf32>
    %3 = vector.broadcast %2 : vector<1x128xf32> to vector<64x128xf32>
    %4 = arith.mulf %1, %3 : vector<64x128xf32>
    %c0_3 = arith.constant 0 : index
    %c0_4 = arith.constant 0 : index
    %5 = vector.load %arg3[%c0_3, %c0_4] : memref<1x128xf32, #tpu.memory_space<vmem>>, vector<1x128xf32>
    %6 = vector.broadcast %5 : vector<1x128xf32> to vector<64x128xf32>
    %7 = arith.addf %4, %6 : vector<64x128xf32>
    %cst = arith.constant 0.000000e+00 : f32
    %8 = vector.broadcast %cst : f32 to vector<64x128xf32>
    %9 = arith.maximumf %7, %8 : vector<64x128xf32>
    %c0_5 = arith.constant 0 : index
    %c0_6 = arith.constant 0 : index
    %10 = vector.load %arg4[%c0_5, %c0_6] : memref<64x128xbf16, #tpu.memory_space<vmem>>, vector<64x128xbf16>
    %11 = arith.extf %10 : vector<64x128xbf16> to vector<64x128xf32>
    %12 = arith.addf %9, %11 : vector<64x128xf32>
    %c0_7 = arith.constant 0 : index
    %c0_8 = arith.constant 0 : index
    %13 = vector.load %arg5[%c0_7, %c0_8] : memref<64x128xf32, #tpu.memory_space<vmem>>, vector<64x128xf32>
    tpu.vector_store %arg5[%c0_7, %c0_8], %12 {strides = array<i32>} : memref<64x128xf32, #tpu.memory_space<vmem>>, vector<64x128xf32>,
    return
  }
  func.func @transform_0(%arg0: i32) -> (i32, i32) {
    %c0_i32 = arith.constant 0 : i32
    %c0_i32_0 = arith.constant 0 : i32
    return %arg0, %c0_i32 : i32, i32
  }
  func.func @transform_1(%arg0: i32) -> (i32, i32) {
    %c0_i32 = arith.constant 0 : i32
    %c0_i32_0 = arith.constant 0 : i32
    %c0_i32_1 = arith.constant 0 : i32
    return %c0_i32, %c0_i32_0 : i32, i32
  }
  func.func @transform_2(%arg0: i32) -> (i32, i32) {
    %c0_i32 = arith.constant 0 : i32
    %c0_i32_0 = arith.constant 0 : i32
    %c0_i32_1 = arith.constant 0 : i32
    return %c0_i32, %c0_i32_0 : i32, i32
  }
  func.func @transform_3(%arg0: i32) -> (i32, i32) {
    %c1_i32 = arith.constant 1 : i32
    %c0_i32 = arith.constant 0 : i32
    return %arg0, %c1_i32 : i32, i32
  }
  func.func @transform_4(%arg0: i32) -> (i32, i32) {
    %c0_i32 = arith.constant 0 : i32
    %c0_i32_0 = arith.constant 0 : i32
    return %arg0, %c0_i32 : i32, i32
  }
}

</mosaic_0001>

<bundles_post_ra>
// kernel: down_forward.5
= control target key start
LH: loop header
LB: loop body
LE: loop exit
PB: predicated region body
PF: predicated region fallthrough
CT: control target
= control target key end

     0   :  { %s500_s12 = smov 0   ;;  %s502_s13 = smov 0   ;;  %s561_s0 = inlined_call_operand.vmem [shape: bf16[128,256], index: 0, kind: input, shape index: {}]   ;;  %s562_s1 = inlined_call_operand.vmem [shape: f32[1,128], index: 1, kind: input, shape index: {}]   ;;  %s563_s2 = inlined_call_operand.vmem [shape: f32[1,128], index: 2, kind: input, shape index: {}]   ;;  %s564_s3 = inlined_call_operand.vmem [shape: bf16[128,128], index: 3, kind: output, shape index: {}]  }
   0x1   :  { %s504_s14 = smov 0  }
   0x2 LB: > { %s372_s15 = sadd.s32 4294967295, %s478_s14   ;;  %s517_s16 = sadd.s32 1, %s478_s14   ;;  %s478_s14 = sphi %s504_s14, %s567_s14   ;;  %s474_s13 = sphi %s502_s13, %s566_s13   ;;  %s470_s12 = sphi %s500_s12, %s565_s12  }
   0x3   : > { %s17_s17 = ssub.s32 %s478_s14, %s517_s16  ;;  %s20_s18 = sadd.s32 1, %s474_s13 }
   0x4   : > { %p18_p0 = scmp.eq.s32.totalorder %s17_s17, 0  ;;  %p27_p1 = scmp.ne.s32.totalorder %s474_s13, %s470_s12 }
   0x5   : > { %p28_p2 = scmp.eq.s32.totalorder %s478_s14, 0  ;;  %p375_p4 = scmp.ge.s32.totalorder %s478_s14, 2 }
   0x6   : > { %s526_s19 = scalar_select %p18_p0, %s474_s13, %s20_s18  }
   0x7   : > { %p29_p3 = por %p28_p2, %p27_p1  ;;  %127 = sbr.rel (%p375_p4) target bundleno = 24 (0x18), region = 24 }
   0xc   : > { %130 = sbr.rel (!%p29_p3) target bundleno = 24 (0x18), region = 28  ;;  %s132_s20 = sand.u32 (%p29_p3), 1, %s474_s13  }
   0xd   : > { %s387_s21 = sshll.u32 (%p29_p3), %s478_s14, 6  ;;  %s376_s22 = sshll.u32 (%p29_p3), %s132_s20, 5 }
   0xe   : > { %s138_s25 = scalar_lea.vmem (%p29_p3), %s561_s0, %s387_s21  ;;  %s134_s26 = scalar_lea.vmem (%p29_p3), [#allocation2], %s376_s22 }
   0xf   : > { %v155_v0 = vld [vmem:[%s138_s25] sm:$0xf] (%p29_p3)  ;;  %v157_v1 = vld [vmem:[%s138_s25 + $0x8] sm:$0xf] (%p29_p3)  ;;  %v159_v2 = vld [vmem:[%s138_s25 + $0x10] sm:$0xf] (%p29_p3) }
  0x10   : > { %156 = vst [vmem:[%s134_s26] sm:$0xf] (%p29_p3), %v155_v0  ;;  %v161_v3 = vld [vmem:[%s138_s25 + $0x18] sm:$0xf] (%p29_p3)  ;;  %v163_v4 = vld [vmem:[%s138_s25 + $0x20] sm:$0xf] (%p29_p3) }
  0x11   : > { %158 = vst [vmem:[%s134_s26 + $0x4] sm:$0xf] %v157_v1  ;;  %v165_v5 = vld [vmem:[%s138_s25 + $0x28] sm:$0xf]  ;;  %v167_v6 = vld [vmem:[%s138_s25 + $0x30] sm:$0xf] }
  0x12   : > { %160 = vst [vmem:[%s134_s26 + $0x8] sm:$0xf] %v159_v2  ;;  %v169_v7 = vld [vmem:[%s138_s25 + $0x38] sm:$0xf] }
  0x13   : > { %162 = vst [vmem:[%s134_s26 + $0xc] sm:$0xf] %v161_v3 }
  0x14   : > { %164 = vst [vmem:[%s134_s26 + $0x10] sm:$0xf] %v163_v4 }
  0x15   : > { %166 = vst [vmem:[%s134_s26 + $0x14] sm:$0xf] %v165_v5 }
  0x16   : > { %168 = vst [vmem:[%s134_s26 + $0x18] sm:$0xf] %v167_v6 }
  0x17   : > { %170 = vst [vmem:[%s134_s26 + $0x1c] sm:$0xf] %v169_v7 }
  0x18 PF: > { %p380_p5 = scmp.ge.s32.totalorder %s478_s14, 1  ;;  %p209_p6 = scmp.lt.s32.totalorder %s478_s14, 3 }
  0x1a   : > { %p210_p7 = pnand %p380_p5, %p209_p6 }
  0x1b   : > { %s216_s27 = sand.u32 (!%p210_p7), 1, %s470_s12   ;;  %s382_s28 = sshll.u32 (!%p210_p7), %s372_s15, 3 }
  0x1c   : > { %213 = sbr.rel (%p210_p7) target bundleno = 48 (0x30), region = 69  ;;  %s381_s29 = sshll.u32 (!%p210_p7), %s216_s27, 5 }
  0x1d   : > { %p241_p8 = scmp.lt.s32.totalorder (!%p210_p7), %s382_s28, 15  ;;  %s218_s5 = scalar_lea.vmem (!%p210_p7), [#allocation2], %s381_s29 }
  0x21   : > { %v454_v8 = vld [vmem:[%s562_s1] ss:$0 sm:$0xff]  ;;  %v424_v10 = vld [vmem:[%s218_s5 + $0x8] sm:$0xff]   ;;  %v425_v11 = vld [vmem:[%s218_s5 + $0x10] sm:$0xff]   ;;  %s569_s28 = smov (!%p241_p8, %s382_s28), 15 }
  0x22   : > { %v389_v9 = vld [vmem:[%s218_s5] sm:$0xff]   ;;  %v394_v15 = vunpack.c.l.bf16 %v424_v10  ;;  %v395_v16 = vunpack.c.h.bf16 %v424_v10  ;;  %v426_v17 = vld [vmem:[%s218_s5 + $0x18] sm:$0xff]   ;;  %v398_v18 = vunpack.c.l.bf16 %v425_v11  ;;  %v399_v19 = vunpack.c.h.bf16 %v425_v11  ;;  %s383_s8 = sshll.u32 %s569_s28, 2 }
  0x23   : > { %v390_v12 = vunpack.c.l.bf16 %v389_v9  ;;  %v391_v13 = vunpack.c.h.bf16 %v389_v9  ;;  %v455_v14 = vld [vmem:[%s563_s2] ss:$0 sm:$0xff]  ;;  %v402_v20 = vunpack.c.l.bf16 %v426_v17  ;;  %v403_v21 = vunpack.c.h.bf16 %v426_v17  ;;  %s244_s11 = scalar_lea.vmem %s564_s3, %s383_s8 }
  0x24   : > { %v268_v24 = vmul.f32 %v454_v8, %v394_v15  ;;  %v269_v25 = vmul.f32 %v454_v8, %v395_v16  ;;  %v270_v26 = vmul.f32 %v454_v8, %v398_v18  ;;  %v271_v27 = vmul.f32 %v454_v8, %v399_v19 }
  0x25   : > { %v266_v22 = vmul.f32 %v454_v8, %v390_v12  ;;  %v267_v23 = vmul.f32 %v454_v8, %v391_v13  ;;  %v272_v28 = vmul.f32 %v454_v8, %v402_v20  ;;  %v273_v29 = vmul.f32 %v454_v8, %v403_v21 }
  0x26   : > { %v280_v32 = vadd.f32 %v455_v14, %v268_v24  ;;  %v281_v33 = vadd.f32 %v455_v14, %v269_v25  ;;  %v282_v34 = vadd.f32 %v455_v14, %v270_v26  ;;  %v283_v35 = vadd.f32 %v455_v14, %v271_v27 }
  0x27   : > { %v278_v30 = vadd.f32 %v455_v14, %v266_v22  ;;  %v279_v31 = vadd.f32 %v455_v14, %v267_v23  ;;  %v284_v36 = vadd.f32 %v455_v14, %v272_v28  ;;  %v285_v37 = vadd.f32 %v455_v14, %v273_v29 }
  0x28   : > { %v288_v40 = vmax.f32 %v280_v32, 0.0  ;;  %v289_v41 = vmax.f32 %v281_v33, 0.0  ;;  %v290_v42 = vmax.f32 %v282_v34, 0.0  ;;  %v291_v43 = vmax.f32 %v283_v35, 0.0 }
  0x29   : > { %v286_v38 = vmax.f32 %v278_v30, 0.0  ;;  %v287_v39 = vmax.f32 %v279_v31, 0.0  ;;  %v292_v44 = vmax.f32 %v284_v36, 0.0  ;;  %v293_v45 = vmax.f32 %v285_v37, 0.0 }
  0x2a   : > { %v412_v47 = vpack.c.bf16 %v289_v41, %v288_v40  ;;  %v417_v48 = vpack.c.bf16 %v291_v43, %v290_v42 }
  0x2b   : > { %v407_v46 = vpack.c.bf16 %v287_v39, %v286_v38  ;;  %v422_v49 = vpack.c.bf16 %v293_v45, %v292_v44 }
  0x2c   : > { %427 = vst [vmem:[%s244_s11 + $0x8] sm:$0xff] %v412_v47  }
  0x2d   : > { %408 = vst [vmem:[%s244_s11] sm:$0xff] %v407_v46  }
  0x2e   : > { %428 = vst [vmem:[%s244_s11 + $0x10] sm:$0xff] %v417_v48  }
  0x2f   : > { %429 = vst [vmem:[%s244_s11 + $0x18] sm:$0xff] %v422_v49  }
  0x30 PF: > { %p10_p9 = scmp.ge.s32.totalorder %s517_s16, 4   ;;  %s565_s12 = smov %s474_s13 }
  0x31   : > { %s566_s13 = smov %s526_s19  ;;  %s567_s14 = smov %s517_s16 }
  0x32   :  { %12 = sbr.rel (!%p10_p9) target bundleno = 2 (0x2), region = 108 }

// kernel: down_forward.4
= control target key start
LH: loop header
LB: loop body
LE: loop exit
PB: predicated region body
PF: predicated region fallthrough
CT: control target
= control target key end

     0   :  { %s997_s15 = smov 0   ;;  %s999_s16 = smov 0   ;;  %s1139_s0 = inlined_call_operand.vmem [shape: bf16[128,108], index: 0, kind: input, shape index: {}]   ;;  %s1140_s1 = inlined_call_operand.vmem [shape: bf16[108,256], index: 1, kind: input, shape index: {}]   ;;  %s1141_s2 = inlined_call_operand.vmem [shape: bf16[128,256], index: 2, kind: output, shape index: {0}]   ;;  %s1142_s3 = inlined_call_operand.vmem [shape: f32[2,1,256], index: 3, kind: output, shape index: {1}]   ;;  %s1143_s4 = inlined_call_operand.vmem [shape: f32[2,1,256], index: 4, kind: output, shape index: {2}]  }
   0x1   :  { %s1001_s17 = smov 0  }
   0x2 LB: > { %s27_s18 = sadd.s32 1, %s966_s16  ;;  %p801_p0 = scmp.ge.s32.totalorder %s970_s17, 1  ;;  %s970_s17 = sphi %s1001_s17, %s15_s17   ;;  %s966_s16 = sphi %s999_s16, %s1145_s16   ;;  %s962_s15 = sphi %s997_s15, %s1144_s15  }
   0x3   : > { %p29_p1 = scmp.ge.s32.totalorder %s27_s18, 2  ;;  %p197_p2 = scmp.lt.s32.totalorder %s970_s17, 3 }
   0x5   : > { %s1147_s18 = smov (%p29_p1, %s27_s18), 0  ;;  %p198_p3 = pnand %p801_p0, %p197_p2 }
   0x6   : > { %s802_s29 = sshll.u32 (!%p198_p3), %s962_s15, 3  ;;  %p264_p5 = scmp.lt.s32.totalorder (!%p198_p3), %s962_s15, 1 }
   0x7   : > { %201 = sbr.rel (%p198_p3) target bundleno = 222 (0xde), region = 28  ;;  %p242_p4 = scmp.lt.s32.totalorder (!%p198_p3), %s802_s29, 15 }
   0xc   : > { %v875_v0 = vld [vmem:[%s1140_s1 + $0x60] sm:$0xf]  ;;  %v909_v1 = vld [vmem:[%s1140_s1 + $0x64] sm:$0x30]  ;;  %vm432_vm0 = vcmask 1045504   ;;  %s1149_s29 = smov (!%p242_p4, %s802_s29), 15 }
   0xd   : > { %v876_v2 = vor.u32 %v909_v1, %v875_v0  ;;  %v908_v3 = vld [vmem:[%s1140_s1 + $0x64] sm:$0xf]  ;;  %v877_v4 = vld [vmem:[%s1140_s1 + $0x68] sm:$0x30]  ;;  %v867_v5 = vld [vmem:[%s1140_s1 + $0x50] sm:$0xf] }
   0xe   : > { %v880_v6 = vor.u32 %v908_v3, %v877_v4  ;;  %v907_v7 = vld [vmem:[%s1140_s1 + $0x54] sm:$0xf0]  ;;  %v906_v8 = vld [vmem:[%s1140_s1 + $0x54] sm:$0xf]  ;;  %v869_v9 = vld [vmem:[%s1140_s1 + $0x58] sm:$0xf0] }
   0xf   : > { %v434_v10 = vsel %vm432_vm0, %v876_v2, 0  ;;  %v868_v12 = vor.u32 %v907_v7, %v867_v5  ;;  %v872_v13 = vor.u32 %v906_v8, %v869_v9  ;;  %v859_v14 = vld [vmem:[%s1140_s1 + $0x40] sm:$0xf]  ;;  %v905_v15 = vld [vmem:[%s1140_s1 + $0x44] sm:$0xf0]  ;;  %s803_s28 = sshll.u32 %s1149_s29, 2 }
  0x10   : > { %440 = vmatpush.bf16.msra.mxu0 %v434_v10  ;;  %910 = vmatpush.bf16.msra.mxu2 %v434_v10  ;;  %v437_v11 = vsel %vm432_vm0, %v880_v6, 0  ;;  %v904_v16 = vld [vmem:[%s1140_s1 + $0x44] sm:$0xf]  ;;  %v861_v17 = vld [vmem:[%s1140_s1 + $0x48] sm:$0xf0]  ;;  %v860_v18 = vor.u32 %v905_v15, %v859_v14  ;;  %s248_s10 = scalar_lea.vmem %s1139_s0, %s803_s28  ;;  %vm419_vm1 = vcmask 883712  }
  0x11   : > { %469 = vmatpush.bf16.msra.mxu1 %v437_v11  ;;  %917 = vmatpush.bf16.msra.mxu3 %v437_v11  ;;  %v864_v19 = vor.u32 %v904_v16, %v861_v17  ;;  %v851_v20 = vld [vmem:[%s1140_s1 + $0x30] sm:$0xf]  ;;  %v903_v21 = vld [vmem:[%s1140_s1 + $0x34] sm:$0xf0]  ;;  %v902_v22 = vld [vmem:[%s1140_s1 + $0x34] sm:$0xf] }
  0x12   : > { %v853_v23 = vld [vmem:[%s1140_s1 + $0x38] sm:$0xf0]  ;;  %v852_v24 = vor.u32 %v903_v21, %v851_v20  ;;  %v843_v26 = vld [vmem:[%s1140_s1 + $0x20] sm:$0xf]  ;;  %v901_v27 = vld [vmem:[%s1140_s1 + $0x24] sm:$0xf0] }
  0x13   : > { %v856_v25 = vor.u32 %v902_v22, %v853_v23  ;;  %v900_v28 = vld [vmem:[%s1140_s1 + $0x24] sm:$0xf]  ;;  %v845_v29 = vld [vmem:[%s1140_s1 + $0x28] sm:$0xf0]  ;;  %v844_v30 = vor.u32 %v901_v27, %v843_v26  ;;  %v835_v32 = vld [vmem:[%s1140_s1 + $0x10] sm:$0xf] }
  0x14   : > { %441 = vmatpush.bf16.msra.mxu0 %v868_v12  ;;  %911 = vmatpush.bf16.msra.mxu2 %v868_v12  ;;  %v848_v31 = vor.u32 %v900_v28, %v845_v29  ;;  %v899_v33 = vld [vmem:[%s1140_s1 + $0x14] sm:$0xf0]  ;;  %v898_v34 = vld [vmem:[%s1140_s1 + $0x14] sm:$0xf]  ;;  %v837_v35 = vld [vmem:[%s1140_s1 + $0x18] sm:$0xf0] }
  0x15   : > { %470 = vmatpush.bf16.msra.mxu1 %v872_v13  ;;  %918 = vmatpush.bf16.msra.mxu3 %v872_v13  ;;  %v836_v36 = vor.u32 %v899_v33, %v835_v32  ;;  %v840_v37 = vor.u32 %v898_v34, %v837_v35  ;;  %v827_v38 = vld [vmem:[%s1140_s1] sm:$0xf]  ;;  %v897_v39 = vld [vmem:[%s1140_s1 + $0x4] sm:$0xf0]  ;;  %v896_v40 = vld [vmem:[%s1140_s1 + $0x4] sm:$0xf] }
  0x16   : > { %v829_v41 = vld [vmem:[%s1140_s1 + $0x8] sm:$0xf0]  ;;  %v828_v42 = vor.u32 %v897_v39, %v827_v38  ;;  %v892_v44 = vld [vmem:[%s248_s10] sm:$0xff]  ;;  %v894_v45 = vld [vmem:[%s248_s10 + $0x10] sm:$0xff]  ;;  %s891_s11 = sshll.u32 %s1149_s29, 3  ;;  %s1151_s15 = smov (!%p264_p5, %s962_s15), 1 }
  0x17   : > { %v832_v43 = vor.u32 %v896_v40, %v829_v41  ;;  %v893_v46 = vld [vmem:[%s248_s10 + $0x8] sm:$0xff]  ;;  %v895_v47 = vld [vmem:[%s248_s10 + $0x18] sm:$0xff]  ;;  %s1112_s14 = scalar_lea.vmem %s1141_s2, %s891_s11  ;;  %s807_s29 = sshll.u32 %s1151_s15, 1  ;;  %vm593_vm2 = vcmask 1040384  }
  0x18   : > { %442 = vmatpush.bf16.msra.mxu0 %v860_v18  ;;  %912 = vmatpush.bf16.msra.mxu2 %v860_v18  ;;  %s267_s21 = scalar_lea.vmem %s1142_s3, %s807_s29  ;;  %s271_s24 = scalar_lea.vmem %s1143_s4, %s807_s29 }
  0x19   : > { %471 = vmatpush.bf16.msra.mxu1 %v864_v19  ;;  %919 = vmatpush.bf16.msra.mxu3 %v864_v19 }
  0x1c   : > { %443 = vmatpush.bf16.msra.mxu0 %v852_v24  ;;  %913 = vmatpush.bf16.msra.mxu2 %v852_v24 }
  0x1d   : > { %472 = vmatpush.bf16.msra.mxu1 %v856_v25  ;;  %920 = vmatpush.bf16.msra.mxu3 %v856_v25 }
  0x20   : > { %444 = vmatpush.bf16.msra.mxu0 %v844_v30  ;;  %914 = vmatpush.bf16.msra.mxu2 %v844_v30 }
  0x21   : > { %473 = vmatpush.bf16.msra.mxu1 %v848_v31  ;;  %921 = vmatpush.bf16.msra.mxu3 %v848_v31 }
  0x24   : > { %445 = vmatpush.bf16.msra.mxu0 %v836_v36  ;;  %915 = vmatpush.bf16.msra.mxu2 %v836_v36 }
  0x25   : > { %474 = vmatpush.bf16.msra.mxu1 %v840_v37  ;;  %922 = vmatpush.bf16.msra.mxu3 %v840_v37 }
  0x28   : > { %446 = vmatpush.bf16.msra.mxu0 %v828_v42  ;;  %916 = vmatpush.bf16.msra.mxu2 %v828_v42 }
  0x29   : > { %475 = vmatpush.bf16.msra.mxu1 %v832_v43  ;;  %923 = vmatpush.bf16.msra.mxu3 %v832_v43 }
  0x2b   : > { %881 = vmatmul.msk.bf16.vlgmr.msra.gmra.mxu0 %vm419_vm1, %v892_v44  ;;  %883 = vmatmul.msk.bf16.vlgmr.msra.gmra.mxu2 %vm419_vm1, %v894_v45 }
  0x2c   : > { %885 = vmatmul.msk.bf16.vlgmr.msra.gmra.mxu1 %vm419_vm1, %v892_v44  ;;  %887 = vmatmul.msk.bf16.vlgmr.msra.gmra.mxu3 %vm419_vm1, %v894_v45 }
  0x3b   : > { %882 = vmatmul.msk.bf16.gmra.mxu0 %vm419_vm1, %v893_v46  ;;  %884 = vmatmul.msk.bf16.gmra.mxu2 %vm419_vm1, %v895_v47 }
  0x3c   : > { %886 = vmatmul.msk.bf16.gmra.mxu1 %vm419_vm1, %v893_v46  ;;  %888 = vmatmul.msk.bf16.gmra.mxu3 %vm419_vm1, %v895_v47 }
  0xa8   : > { %v448_v48 = vpop.f32.mrf.mxu0 }
  0xa9   : > { %v477_v49 = vpop.f32.mrf.mxu1  ;;  %v601_v1 = vmul.f32 %v448_v48, %v448_v48 }
  0xaa   : > { %v548_v50 = vpack.c.bf16 %v477_v49, %v448_v48  ;;  %v602_v4 = vmul.f32 %v477_v49, %v477_v49 }
  0xac   : > { %556 = vst [vmem:[%s1112_s14] sm:$0xff] %v548_v50 }
  0xae   : > { %v458_v51 = vpop.f32.mrf.mxu2 }
  0xaf   : > { %v487_v52 = vpop.f32.mrf.mxu3  ;;  %v609_v23 = vmul.f32 %v458_v51, %v458_v51 }
  0xb0   : > { %v552_v53 = vpack.c.bf16 %v487_v52, %v458_v51  ;;  %v450_v54 = vpop.f32.mrf.mxu0  ;;  %v610_v26 = vmul.f32 %v487_v52, %v487_v52 }
  0xb1   : > { %v479_v55 = vpop.f32.mrf.mxu1  ;;  %v603_v63 = vmul.f32 %v450_v54, %v450_v54  ;;  %v564_v2 = vadd.f32 %v450_v54, %v448_v48 }
  0xb2   : > { %560 = vst [vmem:[%s1112_s14 + $0x20] sm:$0xff] %v552_v53  ;;  %v549_v56 = vpack.c.bf16 %v479_v55, %v450_v54  ;;  %v604_v0 = vmul.f32 %v479_v55, %v479_v55  ;;  %v577_v5 = vadd.f32 %v479_v55, %v477_v49 }
  0xb3   : > { %v617_v8 = vadd.f32 %v603_v63, %v601_v1 }
  0xb4   : > { %557 = vst [vmem:[%s1112_s14 + $0x8] sm:$0xff] %v549_v56  ;;  %v630_v11 = vadd.f32 %v604_v0, %v602_v4 }
  0xb6   : > { %v460_v57 = vpop.f32.mrf.mxu2 }
  0xb7   : > { %v489_v58 = vpop.f32.mrf.mxu3  ;;  %v611_v29 = vmul.f32 %v460_v57, %v460_v57 }
  0xb8   : > { %v553_v59 = vpack.c.bf16 %v489_v58, %v460_v57  ;;  %v453_v60 = vpop.f32.mrf.mxu0  ;;  %v612_v32 = vmul.f32 %v489_v58, %v489_v58 }
  0xb9   : > { %v482_v61 = vpop.f32.mrf.mxu1  ;;  %v605_v3 = vmul.f32 %v453_v60, %v453_v60  ;;  %v565_v9 = vadd.f32 %v564_v2, %v453_v60 }
  0xba   : > { %561 = vst [vmem:[%s1112_s14 + $0x28] sm:$0xff] %v553_v59  ;;  %v550_v62 = vpack.c.bf16 %v482_v61, %v453_v60  ;;  %v606_v6 = vmul.f32 %v482_v61, %v482_v61  ;;  %v578_v12 = vadd.f32 %v577_v5, %v482_v61  ;;  %v596_v5 = vlaneseq }
  0xbb   : > { %v618_v15 = vadd.f32 %v617_v8, %v605_v3 }
  0xbc   : > { %558 = vst [vmem:[%s1112_s14 + $0x10] sm:$0xff] %v550_v62  ;;  %v631_v19 = vadd.f32 %v630_v11, %v606_v6  ;;  %vm598_vm3 = vcmp.lt.s32.totalorder %v596_v5, 256 }
  0xbe   : > { %v463_v7 = vpop.f32.mrf.mxu2 }
  0xbf   : > { %v492_v10 = vpop.f32.mrf.mxu3  ;;  %v613_v36 = vmul.f32 %v463_v7, %v463_v7 }
  0xc0   : > { %v554_v13 = vpack.c.bf16 %v492_v10, %v463_v7  ;;  %v455_v14 = vpop.f32.mrf.mxu0  ;;  %v614_v40 = vmul.f32 %v492_v10, %v492_v10 }
  0xc1   : > { %v566_v16 = vadd.f32 %v565_v9, %v455_v14  ;;  %v607_v17 = vmul.f32 %v455_v14, %v455_v14  ;;  %v484_v18 = vpop.f32.mrf.mxu1 }
  0xc2   : > { %562 = vst [vmem:[%s1112_s14 + $0x30] sm:$0xff] %v554_v13  ;;  %v551_v20 = vpack.c.bf16 %v484_v18, %v455_v14  ;;  %v579_v21 = vadd.f32 %v578_v12, %v484_v18  ;;  %v608_v22 = vmul.f32 %v484_v18, %v484_v18 }
  0xc3   : > { %v567_v24 = vadd.f32 %v566_v16, %v458_v51  ;;  %v619_v25 = vadd.f32 %v618_v15, %v607_v17 }
  0xc4   : > { %559 = vst [vmem:[%s1112_s14 + $0x18] sm:$0xff] %v551_v20  ;;  %v580_v27 = vadd.f32 %v579_v21, %v487_v52  ;;  %v632_v28 = vadd.f32 %v631_v19, %v608_v22 }
  0xc5   : > { %v620_v30 = vadd.f32 %v619_v25, %v609_v23  ;;  %v568_v31 = vadd.f32 %v567_v24, %v460_v57 }
  0xc6   : > { %v633_v33 = vadd.f32 %v632_v28, %v610_v26  ;;  %v465_v34 = vpop.f32.mrf.mxu2  ;;  %v581_v35 = vadd.f32 %v580_v27, %v489_v58 }
  0xc7   : > { %v569_v37 = vadd.f32 %v568_v31, %v463_v7  ;;  %v621_v38 = vadd.f32 %v620_v30, %v611_v29  ;;  %v494_v39 = vpop.f32.mrf.mxu3  ;;  %v615_v45 = vmul.f32 %v465_v34, %v465_v34 }
  0xc8   : > { %v555_v41 = vpack.c.bf16 %v494_v39, %v465_v34  ;;  %v582_v42 = vadd.f32 %v581_v35, %v492_v10  ;;  %v634_v43 = vadd.f32 %v633_v33, %v612_v32  ;;  %v616_v48 = vmul.f32 %v494_v39, %v494_v39 }
  0xc9   : > { %v570_v44 = vadd.f32 %v569_v37, %v465_v34  ;;  %v622_v46 = vadd.f32 %v621_v38, %v613_v36 }
  0xca   : > { %563 = vst [vmem:[%s1112_s14 + $0x38] sm:$0xff] %v555_v41  ;;  %v583_v47 = vadd.f32 %v582_v42, %v494_v39  ;;  %v635_v49 = vadd.f32 %v634_v43, %v614_v40 }
  0xcb   : > { %v571_v50 = vrot.slane %v570_v44, 4  ;;  %v623_v51 = vadd.f32 %v622_v46, %v615_v45 }
  0xcc   : > { %v584_v52 = vrot.slane %v583_v47, 4  ;;  %v636_v53 = vadd.f32 %v635_v49, %v616_v48 }
  0xcd   : > { %v572_v54 = vadd.f32 %v571_v50, %v570_v44  ;;  %v624_v55 = vrot.slane %v623_v51, 4 }
  0xce   : > { %v585_v56 = vadd.f32 %v584_v52, %v583_v47  ;;  %v637_v57 = vrot.slane %v636_v53, 4 }
  0xcf   : > { %v573_v58 = vrot.slane %v572_v54, 2  ;;  %v625_v59 = vadd.f32 %v624_v55, %v623_v51 }
  0xd0   : > { %v586_v60 = vrot.slane %v585_v56, 2  ;;  %v638_v61 = vadd.f32 %v637_v57, %v636_v53 }
  0xd1   : > { %v574_v62 = vadd.f32 %v573_v58, %v572_v54  ;;  %v626_v63 = vrot.slane %v625_v59, 2 }
  0xd2   : > { %v587_v0 = vadd.f32 %v586_v60, %v585_v56  ;;  %v639_v1 = vrot.slane %v638_v61, 2 }
  0xd3   : > { %v627_v2 = vadd.f32 %v626_v63, %v625_v59  ;;  %v575_v3 = vrot.slane %v574_v62, 1 }
  0xd4   : > { %v588_v4 = vrot.slane %v587_v0, 1  ;;  %v640_v6 = vadd.f32 %v639_v1, %v638_v61 }
  0xd5   : > { %v628_v7 = vrot.slane %v627_v2, 1  ;;  %v576_v10 = vadd.f32 %v575_v3, %v574_v62 }
  0xd6   : > { %v589_v8 = vadd.f32 %v588_v4, %v587_v0  ;;  %v641_v9 = vrot.slane %v640_v6, 1 }
  0xd7   : > { %v629_v13 = vadd.f32 %v628_v7, %v627_v2 }
  0xd8   : > { %v592_v11 = vrot.slane %v589_v8, 7  ;;  %v642_v12 = vadd.f32 %v641_v9, %v640_v6 }
  0xda   : > { %v594_v14 = vsel %vm593_vm2, %v576_v10, %v592_v11  ;;  %v645_v15 = vrot.slane %v642_v12, 7 }
  0xdb   : > { %600 = vst.msk [vmem:[%s267_s21] sm:$0x3] %vm598_vm3, %v594_v14 }
  0xdc   : > { %v646_v16 = vsel %vm593_vm2, %v629_v13, %v645_v15 }
  0xdd   : > { %648 = vst.msk [vmem:[%s271_s24] sm:$0x3] %vm598_vm3, %v646_v16 }
  0xde PF: > { %s15_s17 = sadd.s32 1, %s970_s17   ;;  %s1144_s15 = smov %s966_s16 }
  0xdf   : > { %p12_p6 = scmp.ge.s32.totalorder %s15_s17, 4   ;;  %s1145_s16 = smov %s1147_s18 }
  0xe1   :  { %14 = sbr.rel (!%p12_p6) target bundleno = 2 (0x2), region = 93 }

// kernel: down_forward.6
= control target key start
LH: loop header
LB: loop body
LE: loop exit
PB: predicated region body
PF: predicated region fallthrough
CT: control target
= control target key end

     0   :  { %s967_s15 = smov 0   ;;  %s969_s16 = smov 0   ;;  %s1085_s0 = inlined_call_operand.vmem [shape: bf16[128,216], index: 0, kind: input, shape index: {}]   ;;  %s1086_s1 = inlined_call_operand.vmem [shape: bf16[216,128], index: 1, kind: input, shape index: {}]   ;;  %s1087_s2 = inlined_call_operand.vmem [shape: bf16[128,128], index: 2, kind: output, shape index: {0}]   ;;  %s1088_s3 = inlined_call_operand.vmem [shape: f32[2,1,128], index: 3, kind: output, shape index: {1}]   ;;  %s1089_s4 = inlined_call_operand.vmem [shape: f32[2,1,128], index: 4, kind: output, shape index: {2}]  }
   0x1   :  { %s971_s17 = smov 0  }
   0x2 LB: > { %s27_s18 = sadd.s32 1, %s936_s16  ;;  %p739_p0 = scmp.ge.s32.totalorder %s940_s17, 1  ;;  %s940_s17 = sphi %s971_s17, %s15_s17   ;;  %s936_s16 = sphi %s969_s16, %s1091_s16   ;;  %s932_s15 = sphi %s967_s15, %s1090_s15  }
   0x3   : > { %p29_p1 = scmp.ge.s32.totalorder %s27_s18, 2  ;;  %p199_p2 = scmp.lt.s32.totalorder %s940_s17, 3 }
   0x5   : > { %s1093_s18 = smov (%p29_p1, %s27_s18), 0  ;;  %p200_p3 = pnand %p739_p0, %p199_p2 }
   0x6   : > { %s740_s25 = sshll.u32 (!%p200_p3), %s932_s15, 3  ;;  %p265_p5 = scmp.lt.s32.totalorder (!%p200_p3), %s932_s15, 1 }
   0x7   : > { %203 = sbr.rel (%p200_p3) target bundleno = 232 (0xe8), region = 28  ;;  %p243_p4 = scmp.lt.s32.totalorder (!%p200_p3), %s740_s25, 15 }
   0xc   : > { %v851_v0 = vld [vmem:[%s1086_s1 + $0x38] sm:$0xff]  ;;  %v326_v1 = vld [vmem:[%s1086_s1 + $0x68] sm:$0xf]  ;;  %vm457_vm0 = vcmask 1043456   ;;  %v850_v3 = vld [vmem:[%s1086_s1 + $0x30] sm:$0xff]  ;;  %s1095_s25 = smov (!%p243_p4, %s740_s25), 15 }
   0xd   : > { %v416_v2 = vunpack.c.l.b16 %v326_v1  ;;  %461 = vmatpush.bf16.msra.mxu0 %v851_v0  ;;  %880 = vmatpush.bf16.msra.mxu2 %v851_v0  ;;  %v856_v6 = vld [vmem:[%s1086_s1 + $0x60] sm:$0xff]  ;;  %v849_v7 = vld [vmem:[%s1086_s1 + $0x28] sm:$0xff]  ;;  %v855_v8 = vld [vmem:[%s1086_s1 + $0x58] sm:$0xff]  ;;  %s835_s12 = sshll.u32 %s1095_s25, 3  ;;  %vm444_vm1 = vcmask 719872   ;;  %s744_s5 = sshll.u32 %s1095_s25, 2 }
   0xe   : > { %v848_v9 = vld [vmem:[%s1086_s1 + $0x20] sm:$0xff]  ;;  %v854_v10 = vld [vmem:[%s1086_s1 + $0x50] sm:$0xff]  ;;  %v847_v11 = vld [vmem:[%s1086_s1 + $0x18] sm:$0xff]  ;;  %s1027_s23 = scalar_lea.vmem %s1085_s0, %s835_s12  ;;  %s1062_s8 = scalar_lea.vmem %s1087_s2, %s744_s5 }
   0xf   : > { %v430_v4 = vpack.c.b16 %v416_v2, %v416_v2  ;;  %v853_v12 = vld [vmem:[%s1086_s1 + $0x48] sm:$0xff]  ;;  %v846_v13 = vld [vmem:[%s1086_s1 + $0x10] sm:$0xff]  ;;  %v852_v14 = vld [vmem:[%s1086_s1 + $0x40] sm:$0xff]  ;;  %s1097_s15 = smov (!%p265_p5, %s932_s15), 1 }
  0x10   : > { %v845_v15 = vld [vmem:[%s1086_s1 + $0x8] sm:$0xff]  ;;  %v838_v16 = vld [vmem:[%s1027_s23 + $0x14] sm:$0xf]  ;;  %v757_v17 = vld [vmem:[%s1027_s23 + $0x18] sm:$0xf0]  ;;  %s267_s10 = scalar_lea.vmem %s1088_s3, %s1097_s15  ;;  %s270_s13 = scalar_lea.vmem %s1089_s4, %s1097_s15 }
  0x11   : > { %v459_v5 = vsel %vm457_vm0, %v430_v4, 0  ;;  %462 = vmatpush.bf16.msra.mxu0 %v850_v3  ;;  %881 = vmatpush.bf16.msra.mxu2 %v850_v3  ;;  %v836_v18 = vld [vmem:[%s1027_s23 + $0x4] sm:$0xf]  ;;  %v749_v19 = vld [vmem:[%s1027_s23 + $0x8] sm:$0xf0]  ;;  %v760_v20 = vor.u32 %v838_v16, %v757_v17 }
  0x12   : > { %888 = vmatpush.bf16.msra.mxu3 %v459_v5  ;;  %492 = vmatpush.bf16.msra.mxu1 %v459_v5  ;;  %v844_v21 = vld [vmem:[%s1086_s1] sm:$0xff]  ;;  %v837_v23 = vld [vmem:[%s1027_s23 + $0x4] sm:$0xf0]  ;;  %v752_v24 = vor.u32 %v836_v18, %v749_v19  ;;  %v765_v30 = vld [vmem:[%s1027_s23 + $0x28] sm:$0xf0] }
  0x13   : > { %v747_v22 = vld [vmem:[%s1027_s23] sm:$0xf]  ;;  %v841_v26 = vld [vmem:[%s1027_s23 + $0x24] sm:$0xf0]  ;;  %v840_v29 = vld [vmem:[%s1027_s23 + $0x24] sm:$0xf] }
  0x14   : > { %v763_v25 = vld [vmem:[%s1027_s23 + $0x20] sm:$0xf]  ;;  %v748_v27 = vor.u32 %v837_v23, %v747_v22  ;;  %v768_v31 = vor.u32 %v840_v29, %v765_v30  ;;  %v755_v32 = vld [vmem:[%s1027_s23 + $0x10] sm:$0xf]  ;;  %v839_v33 = vld [vmem:[%s1027_s23 + $0x14] sm:$0xf0] }
  0x15   : > { %463 = vmatpush.bf16.msra.mxu0 %v849_v7  ;;  %882 = vmatpush.bf16.msra.mxu2 %v849_v7  ;;  %v764_v28 = vor.u32 %v841_v26, %v763_v25  ;;  %v771_v34 = vld [vmem:[%s1027_s23 + $0x30] sm:$0xf]  ;;  %v843_v35 = vld [vmem:[%s1027_s23 + $0x34] sm:$0xf0]  ;;  %v756_v36 = vor.u32 %v839_v33, %v755_v32  ;;  %v842_v38 = vld [vmem:[%s1027_s23 + $0x34] sm:$0xf] }
  0x16   : > { %889 = vmatpush.bf16.msra.mxu3 %v856_v6  ;;  %493 = vmatpush.bf16.msra.mxu1 %v856_v6  ;;  %v772_v37 = vor.u32 %v843_v35, %v771_v34  ;;  %v773_v39 = vld [vmem:[%s1027_s23 + $0x38] sm:$0xf0] }
  0x17   : > { %v776_v40 = vor.u32 %v842_v38, %v773_v39 }
  0x19   : > { %464 = vmatpush.bf16.msra.mxu0 %v848_v9  ;;  %883 = vmatpush.bf16.msra.mxu2 %v848_v9 }
  0x1a   : > { %890 = vmatpush.bf16.msra.mxu3 %v855_v8  ;;  %494 = vmatpush.bf16.msra.mxu1 %v855_v8 }
  0x1d   : > { %465 = vmatpush.bf16.msra.mxu0 %v847_v11  ;;  %884 = vmatpush.bf16.msra.mxu2 %v847_v11 }
  0x1e   : > { %891 = vmatpush.bf16.msra.mxu3 %v854_v10  ;;  %495 = vmatpush.bf16.msra.mxu1 %v854_v10 }
  0x21   : > { %466 = vmatpush.bf16.msra.mxu0 %v846_v13  ;;  %885 = vmatpush.bf16.msra.mxu2 %v846_v13 }
  0x22   : > { %892 = vmatpush.bf16.msra.mxu3 %v853_v12  ;;  %496 = vmatpush.bf16.msra.mxu1 %v853_v12 }
  0x25   : > { %467 = vmatpush.bf16.msra.mxu0 %v845_v15  ;;  %886 = vmatpush.bf16.msra.mxu2 %v845_v15 }
  0x26   : > { %893 = vmatpush.bf16.msra.mxu3 %v852_v14  ;;  %497 = vmatpush.bf16.msra.mxu1 %v852_v14 }
  0x29   : > { %830 = vmatmul.msk.bf16.vlgmr.msra.gmra.mxu3 %vm444_vm1, %v760_v20  ;;  %468 = vmatpush.bf16.msra.mxu0 %v844_v21 }
  0x2a   : > { %829 = vmatmul.msk.bf16.vlgmr.msra.gmra.mxu1 %vm444_vm1, %v752_v24  ;;  %887 = vmatpush.bf16.msra.mxu2 %v844_v21 }
  0x2c   : > { %469 = vmatmul.bf16.vlgmr.msra.gmra.mxu0 %v748_v27 }
  0x2d   : > { %479 = vmatmul.bf16.vlgmr.msra.gmra.mxu2 %v764_v28 }
  0x39   : > { %831 = vmatmul.msk.bf16.gmra.mxu3 %vm444_vm1, %v768_v31 }
  0x3c   : > { %474 = vmatmul.bf16.gmra.mxu0 %v756_v36 }
  0x3d   : > { %484 = vmatmul.bf16.gmra.mxu2 %v772_v37 }
  0x49   : > { %832 = vmatmul.msk.bf16.gmra.mxu3 %vm444_vm1, %v776_v40 }
  0xa7   : > { %v499_v41 = vpop.f32.mrf.mxu1 }
  0xa9   : > { %v470_v42 = vpop.f32.mrf.mxu0 }
  0xaa   : > { %v500_v45 = vadd.f32 %v499_v41, %v470_v42 }
  0xac   : > { %v504_v43 = vpop.f32.mrf.mxu3  ;;  %v576_v57 = vmul.f32 %v500_v45, %v500_v45 }
  0xaf   : > { %v501_v44 = vpop.f32.mrf.mxu1 }
  0xb0   : > { %v480_v50 = vpop.f32.mrf.mxu2 }
  0xb1   : > { %v472_v46 = vpop.f32.mrf.mxu0 }
  0xb2   : > { %v502_v47 = vadd.f32 %v501_v44, %v472_v46 }
  0xb4   : > { %v506_v48 = vpop.f32.mrf.mxu3  ;;  %v860_v49 = vpack.c.bf16 %v502_v47, %v500_v45  ;;  %v577_v59 = vmul.f32 %v502_v47, %v502_v47  ;;  %v562_v63 = vadd.f32 %v502_v47, %v500_v45 }
  0xb6   : > { %861 = vst [vmem:[%s1062_s8] sm:$0xff] %v860_v49   ;;  %v584_v2 = vadd.f32 %v577_v59, %v576_v57 }
  0xb8   : > { %v482_v53 = vpop.f32.mrf.mxu2 }
  0xb9   : > { %v475_v51 = vpop.f32.mrf.mxu0 }
  0xba   : > { %v505_v55 = vadd.f32 %v504_v43, %v475_v51 }
  0xbc   : > { %v509_v52 = vpop.f32.mrf.mxu3  ;;  %v578_v0 = vmul.f32 %v505_v55, %v505_v55  ;;  %v563_v3 = vadd.f32 %v562_v63, %v505_v55 }
  0xbd   : > { %v510_v60 = vadd.f32 %v509_v52, %v480_v50 }
  0xbe   : > { %v585_v6 = vadd.f32 %v584_v2, %v578_v0 }
  0xbf   : > { %v580_v10 = vmul.f32 %v510_v60, %v510_v60 }
  0xc0   : > { %v485_v5 = vpop.f32.mrf.mxu2 }
  0xc1   : > { %v477_v54 = vpop.f32.mrf.mxu0 }
  0xc2   : > { %v507_v56 = vadd.f32 %v506_v48, %v477_v54 }
  0xc4   : > { %v511_v58 = vpop.f32.mrf.mxu3  ;;  %v865_v61 = vpack.c.bf16 %v507_v56, %v505_v55  ;;  %v579_v4 = vmul.f32 %v507_v56, %v507_v56  ;;  %v564_v7 = vadd.f32 %v563_v3, %v507_v56 }
  0xc5   : > { %v512_v62 = vadd.f32 %v511_v58, %v482_v53 }
  0xc6   : > { %877 = vst [vmem:[%s1062_s8 + $0x8] sm:$0xff] %v865_v61   ;;  %v586_v9 = vadd.f32 %v585_v6, %v579_v4  ;;  %v565_v11 = vadd.f32 %v564_v7, %v510_v60 }
  0xc7   : > { %v870_v1 = vpack.c.bf16 %v512_v62, %v510_v60  ;;  %v581_v15 = vmul.f32 %v512_v62, %v512_v62 }
  0xc8   : > { %v587_v13 = vadd.f32 %v586_v9, %v580_v10  ;;  %v566_v14 = vadd.f32 %v565_v11, %v512_v62  ;;  %v487_v17 = vpop.f32.mrf.mxu2 }
  0xc9   : > { %878 = vst [vmem:[%s1062_s8 + $0x10] sm:$0xff] %v870_v1  }
  0xca   : > { %v588_v19 = vadd.f32 %v587_v13, %v581_v15 }
  0xcc   : > { %v514_v8 = vpop.f32.mrf.mxu3 }
  0xcd   : > { %v515_v12 = vadd.f32 %v514_v8, %v485_v5 }
  0xcf   : > { %v582_v16 = vmul.f32 %v515_v12, %v515_v12  ;;  %v567_v20 = vadd.f32 %v566_v14, %v515_v12 }
  0xd1   : > { %v589_v22 = vadd.f32 %v588_v19, %v582_v16 }
  0xd4   : > { %v516_v18 = vpop.f32.mrf.mxu3 }
  0xd5   : > { %v517_v21 = vadd.f32 %v516_v18, %v487_v17 }
  0xd7   : > { %v875_v23 = vpack.c.bf16 %v517_v21, %v515_v12  ;;  %v568_v24 = vadd.f32 %v567_v20, %v517_v21  ;;  %v583_v25 = vmul.f32 %v517_v21, %v517_v21 }
  0xd9   : > { %879 = vst [vmem:[%s1062_s8 + $0x18] sm:$0xff] %v875_v23   ;;  %v569_v26 = vrot.slane %v568_v24, 4  ;;  %v590_v27 = vadd.f32 %v589_v22, %v583_v25 }
  0xdb   : > { %v570_v28 = vadd.f32 %v569_v26, %v568_v24  ;;  %v591_v29 = vrot.slane %v590_v27, 4 }
  0xdd   : > { %v571_v30 = vrot.slane %v570_v28, 2  ;;  %v592_v31 = vadd.f32 %v591_v29, %v590_v27 }
  0xdf   : > { %v572_v32 = vadd.f32 %v571_v30, %v570_v28  ;;  %v593_v33 = vrot.slane %v592_v31, 2 }
  0xe1   : > { %v573_v34 = vrot.slane %v572_v32, 1  ;;  %v594_v35 = vadd.f32 %v593_v33, %v592_v31 }
  0xe3   : > { %v574_v36 = vadd.f32 %v573_v34, %v572_v32  ;;  %v595_v37 = vrot.slane %v594_v35, 1 }
  0xe5   : > { %575 = vst [vmem:[%s267_s10] sm:$0x1] %v574_v36  ;;  %v596_v38 = vadd.f32 %v595_v37, %v594_v35 }
  0xe7   : > { %597 = vst [vmem:[%s270_s13] sm:$0x1] %v596_v38 }
  0xe8 PF: > { %s15_s17 = sadd.s32 1, %s940_s17   ;;  %s1090_s15 = smov %s936_s16 }
  0xe9   : > { %p12_p6 = scmp.ge.s32.totalorder %s15_s17, 4   ;;  %s1091_s16 = smov %s1093_s18 }
  0xeb   :  { %14 = sbr.rel (!%p12_p6) target bundleno = 2 (0x2), region = 93 }

// kernel: down_forward.7
= control target key start
LH: loop header
LB: loop body
LE: loop exit
PB: predicated region body
PF: predicated region fallthrough
CT: control target
= control target key end

     0   :  { %9 = vsyncpa [#allocation4], 0  ;;  %s785_s0 = inlined_call_operand.vmem [shape: bf16[128,128], index: 0, kind: input, shape index: {}]   ;;  %s786_s1 = inlined_call_operand.vmem [shape: f32[1,128], index: 1, kind: input, shape index: {}]   ;;  %s787_s2 = inlined_call_operand.vmem [shape: f32[1,128], index: 2, kind: input, shape index: {}]   ;;  %s788_s3 = inlined_call_operand.vmem [shape: bf16[128,256], index: 3, kind: input, shape index: {}]   ;;  %s789_s4 = inlined_call_operand.hbm [shape: f32[128,128], index: 4, kind: output, shape index: {}]  }
   0x1   :  { %11 = vsyncpa [#allocation4 + $0x1], 0  ;;  %s670_s15 = smov 0   ;;  %s672_s16 = smov 0  }
   0x2   :  { %s674_s17 = smov 0   ;;  %s676_s18 = smov 0  }
   0x3 LB: > { %s691_s19 = sadd.s32 4294967295, %s641_s18   ;;  %s472_s20 = sadd.s32 4294967294, %s641_s18   ;;  %s641_s18 = sphi %s676_s18, %s795_s18   ;;  %s637_s17 = sphi %s674_s17, %s794_s17   ;;  %s633_s16 = sphi %s672_s16, %s793_s16   ;;  %s629_s15 = sphi %s670_s15, %s792_s15  }
   0x4   : > { %s695_s21 = sadd.s32 1, %s641_s18   ;;  %s92_s22 = sadd.s32 1, %s637_s17 }
   0x5   : > { %s89_s23 = ssub.s32 %s641_s18, %s695_s21  ;;  %p99_p0 = scmp.ne.s32.totalorder %s637_s17, %s633_s16 }
   0x6   : > { %p90_p1 = scmp.eq.s32.totalorder %s89_s23, 0  ;;  %p100_p2 = scmp.eq.s32.totalorder %s641_s18, 0 }
   0x7   : > { %p129_p3 = scmp.eq.s32.totalorder %s691_s19, 1  ;;  %p134_p4 = scmp.ne.s32.totalorder %s633_s16, %s629_s15 }
   0x8   : > { %s707_s24 = scalar_select %p90_p1, %s637_s17, %s92_s22  }
   0x9   : > { %p101_p5 = por %p100_p2, %p99_p0  ;;  %p709_p6 = por %p129_p3, %p99_p0 }
   0xa   : > { %p135_p7 = scmp.eq.s32.totalorder %s472_s20, 1  ;;  %p474_p9 = scmp.ge.s32.totalorder %s641_s18, 2 }
   0xc   : > { %p713_p8 = por %p135_p7, %p134_p4  ;;  %157 = sbr.rel (%p474_p9) target bundleno = 29 (0x1d), region = 24 }
  0x11   : > { %169 = sbr.rel (!%p101_p5) target bundleno = 29 (0x1d), region = 32  ;;  %s171_s27 = sand.u32 (%p101_p5), 1, %s637_s17  }
  0x12   : > { %s496_s28 = sshll.u32 (%p101_p5), %s641_s18, 6  ;;  %s475_s29 = sshll.u32 (%p101_p5), %s171_s27, 5 }
  0x13   : > { %s420_s6 = scalar_lea.vmem (%p101_p5), %s788_s3, %s496_s28  ;;  %s173_s7 = scalar_lea.vmem (%p101_p5), [#allocation2], %s475_s29 }
  0x14   : > { %v478_v0 = vld [vmem:[%s420_s6 + $0x4] sm:$0xf] (%p101_p5)  ;;  %v479_v1 = vld [vmem:[%s420_s6 + $0xc] sm:$0xf] (%p101_p5)  ;;  %v480_v2 = vld [vmem:[%s420_s6 + $0x14] sm:$0xf] (%p101_p5) }
  0x15   : > { %196 = vst [vmem:[%s173_s7] sm:$0xf] (%p101_p5), %v478_v0  ;;  %v481_v3 = vld [vmem:[%s420_s6 + $0x1c] sm:$0xf] (%p101_p5)  ;;  %v482_v4 = vld [vmem:[%s420_s6 + $0x24] sm:$0xf] (%p101_p5) }
  0x16   : > { %198 = vst [vmem:[%s173_s7 + $0x4] sm:$0xf] %v479_v1  ;;  %v483_v5 = vld [vmem:[%s420_s6 + $0x2c] sm:$0xf]  ;;  %v484_v6 = vld [vmem:[%s420_s6 + $0x34] sm:$0xf] }
  0x17   : > { %200 = vst [vmem:[%s173_s7 + $0x8] sm:$0xf] %v480_v2  ;;  %v485_v7 = vld [vmem:[%s420_s6 + $0x3c] sm:$0xf] }
  0x18   : > { %202 = vst [vmem:[%s173_s7 + $0xc] sm:$0xf] %v481_v3 }
  0x19   : > { %204 = vst [vmem:[%s173_s7 + $0x10] sm:$0xf] %v482_v4 }
  0x1a   : > { %206 = vst [vmem:[%s173_s7 + $0x14] sm:$0xf] %v483_v5 }
  0x1b   : > { %208 = vst [vmem:[%s173_s7 + $0x18] sm:$0xf] %v484_v6 }
  0x1c   : > { %210 = vst [vmem:[%s173_s7 + $0x1c] sm:$0xf] %v485_v7 }
  0x1d PF: > { %p486_p10 = scmp.ge.s32.totalorder %s641_s18, 1  ;;  %p249_p11 = scmp.lt.s32.totalorder %s641_s18, 3 }
  0x1f   : > { %p250_p12 = pnand %p486_p10, %p249_p11 }
  0x20   : > { %s728_s8 = sand.u32 (!%p250_p12), 1, %s633_s16   ;;  %s489_s9 = sshll.u32 (!%p250_p12), %s691_s19, 3 }
  0x21   : > { %253 = sbr.rel (%p250_p12) target bundleno = 63 (0x3f), region = 73  ;;  %s487_s10 = sshll.u32 (!%p250_p12), %s728_s8, 5 }
  0x22   : > { %p287_p13 = scmp.lt.s32.totalorder (!%p250_p12), %s489_s9, 15  ;;  %s732_s11 = scalar_lea.vmem (!%p250_p12), [#allocation2], %s487_s10 }
  0x23   : > { %s488_s29 = sshll.u32 (!%p250_p12), %s728_s8, 6  ;;  %s497_s30 = sshll.u32 (!%p250_p12), %s691_s19, 6 }
  0x24   : > { %s386_s7 = scalar_lea.hbm (!%p250_p12), %s789_s4, %s497_s30  ;;  %s285_s19 = scalar_lea.vmem (!%p250_p12), [#allocation3], %s488_s29 }
  0x25   : > { %s389_s10 = sshll.u32 (!%p250_p12), %s386_s7, 4  ;;  %s599_s22 = scalar_lea.hbm (!%p250_p12), %s789_s4, 128  ;;  %s390_s10 = int_to_ptr.hbm [resolvable:$true] %s389_s10 }
  0x26   : > { %s797_s9 = smov (!%p287_p13, %s489_s9), 15  ;;  %v515_v8 = vld [vmem:[%s732_s11] sm:$0xff]   ;;  %v533_v9 = vld [vmem:[%s732_s11 + $0x8] sm:$0xff]   ;;  %v737_v10 = vld [vmem:[%s732_s11 + $0x10] sm:$0xff]  }
  0x27   : > { %s490_s12 = sshll.u32 %s797_s9, 2  ;;  %v577_v11 = vld [vmem:[%s786_s1] ss:$0 sm:$0xff]  ;;  %v516_v12 = vunpack.c.l.bf16 %v515_v8  ;;  %v517_v14 = vunpack.c.h.bf16 %v515_v8  ;;  %v520_v16 = vunpack.c.l.bf16 %v533_v9  ;;  %v521_v17 = vunpack.c.h.bf16 %v533_v9  ;;  %v535_v42 = vld [vmem:[%s732_s11 + $0x18] sm:$0xff]   ;;  %s387_s9 = sshll.u32 %s285_s19, 4  ;;  %s388_s9 = int_to_ptr.vmem [resolvable:$true] %s387_s9 }
  0x28   : > { %s290_s20 = scalar_lea.vmem %s785_s0, %s490_s12  ;;  %v524_v19 = vunpack.c.l.bf16 %v737_v10  ;;  %v578_v21 = vld [vmem:[%s787_s2] ss:$0 sm:$0xff]  ;;  %v525_v53 = vunpack.c.h.bf16 %v737_v10  ;;  %v528_v54 = vunpack.c.l.bf16 %v535_v42  ;;  %v529_v61 = vunpack.c.h.bf16 %v535_v42  ;;  %s375_s11 = scalar_lea.sflag [#allocation4], %s728_s8 }
  0x29   : > { %v499_v13 = vld [vmem:[%s290_s20] sm:$0xff]   ;;  %v530_v15 = vld [vmem:[%s290_s20 + $0x8] sm:$0xff]   ;;  %v531_v18 = vld [vmem:[%s290_s20 + $0x10] sm:$0xff]   ;;  %s593_s12 = sshra.s32 %s390_s10, 4  ;;  %s594_s12 = int_to_ptr.hbm [resolvable:$true] %s593_s12 }
  0x2a   : > { %v500_v20 = vunpack.c.l.bf16 %v499_v13  ;;  %v501_v22 = vunpack.c.h.bf16 %v499_v13  ;;  %v504_v23 = vunpack.c.l.bf16 %v530_v15  ;;  %v505_v24 = vunpack.c.h.bf16 %v530_v15  ;;  %v532_v25 = vld [vmem:[%s290_s20 + $0x18] sm:$0xff]   ;;  %s595_s13 = scalar_lea.hbm %s594_s12, 64  ;;  %p600_p3 = scmp.lt.s32.totalorder %s594_s12, %s789_s4 }
  0x2b   : > { %v508_v26 = vunpack.c.l.bf16 %v531_v18  ;;  %v509_v27 = vunpack.c.h.bf16 %v531_v18  ;;  %v512_v28 = vunpack.c.l.bf16 %v532_v25  ;;  %v513_v29 = vunpack.c.h.bf16 %v532_v25  ;;  %p596_p0 = scmp.ne.s32.totalorder %s594_s12, %s595_s13  ;;  %p601_p4 = scmp.lt.s32.totalorder %s599_s22, %s595_s13 }
  0x2c   : > { %v314_v30 = vmul.f32 %v577_v11, %v500_v20  ;;  %v315_v31 = vmul.f32 %v577_v11, %v501_v22  ;;  %v316_v32 = vmul.f32 %v577_v11, %v504_v23  ;;  %v317_v33 = vmul.f32 %v577_v11, %v505_v24 }
  0x2d   : > { %v318_v34 = vmul.f32 %v577_v11, %v508_v26  ;;  %v319_v35 = vmul.f32 %v577_v11, %v509_v27  ;;  %v320_v36 = vmul.f32 %v577_v11, %v512_v28  ;;  %v321_v37 = vmul.f32 %v577_v11, %v513_v29  ;;  %p597_p1 = pnand %p596_p0, %p709_p6  ;;  %p602_p5 = por %p601_p4, %p600_p3 }
  0x2e   : > { %v326_v38 = vadd.f32 %v578_v21, %v314_v30  ;;  %v327_v39 = vadd.f32 %v578_v21, %v315_v31  ;;  %v328_v40 = vadd.f32 %v578_v21, %v316_v32  ;;  %v329_v41 = vadd.f32 %v578_v21, %v317_v33 }
  0x2f   : > { %v330_v43 = vadd.f32 %v578_v21, %v318_v34  ;;  %v331_v44 = vadd.f32 %v578_v21, %v319_v35  ;;  %v332_v45 = vadd.f32 %v578_v21, %v320_v36  ;;  %v333_v46 = vadd.f32 %v578_v21, %v321_v37  ;;  %p598_p2 = pneg %p597_p1 }
  0x30   : > { %v334_v47 = vmax.f32 %v326_v38, 0.0  ;;  %v335_v48 = vmax.f32 %v327_v39, 0.0  ;;  %v336_v49 = vmax.f32 %v328_v40, 0.0  ;;  %v337_v50 = vmax.f32 %v329_v41, 0.0 }
  0x31   : > { %v338_v51 = vmax.f32 %v330_v43, 0.0  ;;  %v339_v52 = vmax.f32 %v331_v44, 0.0  ;;  %v340_v58 = vmax.f32 %v332_v45, 0.0  ;;  %v341_v60 = vmax.f32 %v333_v46, 0.0  ;;  %p603_p7 = pnand %p602_p5, %p598_p2 }
  0x32   : > { %v358_v55 = vadd.f32 %v516_v12, %v334_v47  ;;  %v359_v56 = vadd.f32 %v517_v14, %v335_v48  ;;  %v360_v57 = vadd.f32 %v520_v16, %v336_v49  ;;  %v361_v59 = vadd.f32 %v521_v17, %v337_v50 }
  0x33   : > { %v362_v62 = vadd.f32 %v524_v19, %v338_v51  ;;  %v363_v63 = vadd.f32 %v525_v53, %v339_v52  ;;  %v364_v0 = vadd.f32 %v528_v54, %v340_v58  ;;  %v365_v1 = vadd.f32 %v529_v61, %v341_v60 }
  0x34   : > { %366 = vst [vmem:[%s285_s19] sm:$0xff] %v358_v55 }
  0x35   : > { %367 = vst [vmem:[%s285_s19 + $0x8] sm:$0xff] %v359_v56 }
  0x36   : > { %368 = vst [vmem:[%s285_s19 + $0x10] sm:$0xff] %v360_v57 }
  0x37   : > { %369 = vst [vmem:[%s285_s19 + $0x18] sm:$0xff] %v361_v59 }
  0x38   : > { %370 = vst [vmem:[%s285_s19 + $0x20] sm:$0xff] %v362_v62 }
  0x39   : > { %371 = vst [vmem:[%s285_s19 + $0x28] sm:$0xff] %v363_v63 }
  0x3a   : > { %372 = vst [vmem:[%s285_s19 + $0x30] sm:$0xff] %v364_v0 }
  0x3b   : > { %373 = vst [vmem:[%s285_s19 + $0x38] sm:$0xff] %v365_v1 }
  0x3c   : > { %606 = shalt.err (!%p603_p7)
}
  0x3d   : > { %s643_s8 = smov 128   ;;  %s644_s28 = smov 8  }
  0x3e   : > { %536 = dma.vmem_to_hbm [thread:$0]  (%p709_p6), %s388_s9, 1024, %s390_s10, %s375_s11, %s643_s8, %s643_s8, %s644_s28  }
  0x3f PF: > { %s404_s29 = sand.u32 1, %s629_s15   ;;  %p539_p10 = pnand %p474_p9, %p713_p8 }
  0x40   : > { %s405_s30 = scalar_lea.sflag [#allocation4], %s404_s29 }
  0x41   : > { %p540_p11 = pneg %p539_p10 }
  0x43   : > { %624 = dma.done.wait (%p540_p11), %s405_s30, 1024  }
  0x44   : > { %626 = vsyncadd (%p540_p11), %s405_s30, 4294966272  ;;  %p14_p12 = scmp.ge.s32.totalorder %s695_s21, 4   ;;  %s792_s15 = smov %s633_s16 }
  0x45   : > { %s793_s16 = smov %s637_s17  ;;  %s794_s17 = smov %s707_s24 }
  0x46   : > { %s795_s18 = smov %s695_s21  ;;  %16 = sbr.rel (!%p14_p12) target bundleno = 3 (0x3), region = 120 }
  0x4b   :  { %411 = vsyncpa [#allocation4], 1 }
  0x4c   :  { %413 = vsyncpa [#allocation4 + $0x1], 1 }

</bundles_post_ra>
